<compile_context>
chip_gen: v7x
topology: tpu7x:2x2x1
jax: 0.10.0
libtpu: 0.0.40
codegen_flags: <defaults>
</compile_context>

<pallas_src>
import functools
import math

import jax
import jax.numpy as jnp
from jax.experimental import pallas as pl
from jax.experimental.pallas import tpu as pltpu


def _round_up(x, m):
    return ((x + m - 1) // m) * m


# ---------------------------------------------------------------------------
# Reference chain (exact Sequential.forward semantics, pure jnp)
# ---------------------------------------------------------------------------
def _chain_reference(modules, x):
    args = (x,)
    for module in modules:
        if not isinstance(args, (list, tuple)):
            args = [args]
        args = module.emit(module.params(), *args)
    return args


# ---------------------------------------------------------------------------
# Fused chain kernel: whole module chain on one batch tile
# ---------------------------------------------------------------------------
def _fused_chain_kernel(x_ref, *refs, plan_modules, param_counts):
    o_ref = refs[-1]
    param_refs = refs[:-1]

    args = (x_ref[...],)
    idx = 0
    for module, n_params in zip(plan_modules, param_counts):
        p_vals = tuple(r[...] for r in param_refs[idx:idx + n_params])
        idx += n_params
        if not isinstance(args, (list, tuple)):
            args = [args]
        args = module.emit(p_vals, *args)

    out = args[0] if isinstance(args, (list, tuple)) else args
    o_ref[...] = out.astype(o_ref.dtype)


# ---------------------------------------------------------------------------
# Trace-time plan building (+ Split->Add->Linear peephole, exact x2 fold)
# ---------------------------------------------------------------------------
def _build_plan(modules):
    plan = [(m, tuple(m.params())) for m in modules]
    folded = []
    i = 0
    while i < len(plan):
        if (i + 2 < len(plan)
                and isinstance(plan[i][0], SplitModule)
                and isinstance(plan[i + 1][0], AddModule)
                and isinstance(plan[i + 2][0], LinearModule)):
            # (x + x) @ W + b  ==  x @ (2W) + b ; 2*W is exact in bf16.
            lin, (w, b) = plan[i + 2]
            folded.append((lin, (w * jnp.asarray(2, w.dtype), b)))
            i += 3
        else:
            folded.append(plan[i])
            i += 1
    return folded


def _choose_tile(b_pad, max_rows):
    """Largest 8-aligned divisor of b_pad <= max_rows, preferring an even
    grid (so v7x's two TensorCores both get work) when that costs at most 2x
    tile size."""
    hi = min(max_rows, b_pad)
    cands = [d for d in range(8, hi + 1, 8) if b_pad % d == 0]
    if not cands:
        return None
    best = max(cands)
    even = [d for d in cands if (b_pad // d) % 2 == 0]
    if even and max(even) * 2 >= best:
        return max(even)
    return best


# ---------------------------------------------------------------------------
# Fused forward: one pallas_call for the whole chain
# ---------------------------------------------------------------------------
def fused_forward(modules, x, *, block_m=1024):
    B, K = x.shape
    in_itemsize = x.dtype.itemsize

    out_aval = jax.eval_shape(lambda xx: _chain_reference(modules, xx), x)
    if isinstance(out_aval, (list, tuple)):
        if len(out_aval) != 1:
            raise NotImplementedError(
                "fused Sequential supports a single final array output")
        out_aval = out_aval[0]
    n_out = out_aval.shape[-1]
    out_dtype = out_aval.dtype
    out_itemsize = jnp.dtype(out_dtype).itemsize

    plan = _build_plan(modules)
    params, param_counts = [], []
    for _, p in plan:
        param_counts.append(len(p))
        params.extend(p)
    param_bytes = sum(int(p.size) * p.dtype.itemsize for p in params)

    # -------- generation-aware VMEM budget --------
    try:
        info = pltpu.get_tpu_info()
        vmem_cap = int(getattr(info, "vmem_capacity_bytes", 64 << 20))
    except Exception:
        vmem_cap = 64 << 20                      # conservative (v7x-sized)
    vmem_ceiling = int(vmem_cap * 0.85)          # ~54 MiB v7x, ~108 MiB v5e/v6e

    # Per-row activation bytes: double-buffered in/out tiles + intermediates.
    inter_per_row = 0
    for m, _ in plan:
        if isinstance(m, LinearModule):
            inter_per_row += m.w.shape[1] * jnp.dtype(m.out_dtype).itemsize
    bytes_per_row = (2 * K * in_itemsize + 2 * n_out * out_itemsize
                     + 2 * inter_per_row)
    act_budget = max(vmem_ceiling - param_bytes - (8 << 20), 4 << 20)
    max_rows = max(8, (act_budget // max(bytes_per_row, 1)) // 8 * 8)
    max_rows = min(block_m, max_rows)

    # -------- tile selection (avoid host-side pad whenever possible) --------
    b_pad = _round_up(B, 8)
    tm = _choose_tile(b_pad, max_rows)
    if tm is None or (tm < min(256, max_rows) and b_pad > max_rows):
        # No reasonably sized divisor: fall back to padding a ragged tail.
        tm = min(max_rows, b_pad)
        b_pad = _round_up(B, tm)
    if b_pad != B:
        x = jnp.pad(x, ((0, b_pad - B), (0, 0)))

    # -------- specs --------
    x_spec = pl.BlockSpec((tm, K), lambda i: (i, 0))
    out_spec = pl.BlockSpec((tm, n_out), lambda i: (i, 0))

    def _param_specs(single_buffer):
        specs = []
        for p in params:
            idx_map = (lambda nd: (lambda i: (0,) * nd))(p.ndim)
            if single_buffer:
                # Constant index_map -> second buffer is pure waste.
                specs.append(pl.BlockSpec(p.shape, idx_map,
                                          pipeline_mode=pl.Buffered(1)))
            else:
                specs.append(pl.BlockSpec(p.shape, idx_map))
        return specs

    # -------- advisory cost estimate --------
    flops = 0
    for m, _ in plan:
        if isinstance(m, LinearModule):
            k_in, k_o = m.w.shape
            flops += 2 * b_pad * k_in * k_o
    bytes_accessed = (b_pad * K * in_itemsize + param_bytes
                      + b_pad * n_out * out_itemsize)
    cost = pl.CostEstimate(flops=flops, transcendentals=0,
                           bytes_accessed=bytes_accessed)

    vmem_need = tm * bytes_per_row + param_bytes
    vmem_limit = int(min(max(vmem_need + (8 << 20), 32 << 20), vmem_ceiling))

    kernel = functools.partial(_fused_chain_kernel,
                               plan_modules=tuple(m for m, _ in plan),
                               param_counts=tuple(param_counts))

    def _run(param_specs):
        return pl.pallas_call(
            kernel,
            out_shape=jax.ShapeDtypeStruct((b_pad, n_out), out_dtype),
            grid_spec=pltpu.PrefetchScalarGridSpec(
                num_scalar_prefetch=0,
                grid=(b_pad // tm,),
                in_specs=[x_spec] + list(param_specs),
                out_specs=out_spec,
            ),
            compiler_params=pltpu.CompilerParams(
                # Batch tiles are independent -> shard across v7x's 2 TCs.
                dimension_semantics=("parallel",),
                vmem_limit_bytes=vmem_limit,
            ),
            cost_estimate=cost,
        )(x, *params)

    try:
        out = _run(_param_specs(single_buffer=True))
    except Exception:
        # Fallback if single-buffered (Buffered(1)) params are unsupported.
        out = _run(_param_specs(single_buffer=False))

    return out[:B] if b_pad != B else out


# ---------------------------------------------------------------------------
# Module wrappers (parameters built deterministically in-script)
# ---------------------------------------------------------------------------
class LinearModule:
    """torch.nn.Linear equivalent with optional fused ReLU.

    Weights stored bf16 as (in, out) so the MXU runs bf16 with an f32
    accumulator; bias + ReLU stay in f32 (v5e VPU/EUP have no bf16 path).
    `out_dtype=bfloat16` for layers feeding another Linear (bf16 carry).
    """

    def __init__(self, key, in_features, out_features, activation=None,
                 weight_dtype=jnp.bfloat16, out_dtype=jnp.float32):
        kw, kb = jax.random.split(key)
        scale = 1.0 / math.sqrt(in_features)
        self.w = jax.random.uniform(
            kw, (in_features, out_features), jnp.float32, -scale, scale
        ).astype(weight_dtype)
        self.b = jax.random.uniform(
            kb, (1, out_features), jnp.float32, -scale, scale)
        self.activation = activation
        self.out_dtype = jnp.dtype(out_dtype)

    def params(self):
        return (self.w, self.b)

    def emit(self, params, x):
        w, b = params
        y = jnp.dot(x.astype(w.dtype), w, preferred_element_type=jnp.float32)
        y = y + b.astype(jnp.float32)
        if self.activation == "relu":
            y = jnp.maximum(y, 0.0)
        return y.astype(self.out_dtype)

    def __call__(self, x):
        return fused_forward([self], x)


class SplitModule:
    """Returns a tuple; the next module receives two positional args."""

    def params(self):
        return ()

    def emit(self, params, x):
        return x, x

    def __call__(self, x):
        return x, x


class AddModule:
    """Consumes two args.  Inside the fused kernel, Split->Add->Linear is
    folded into the next layer's weights (exact x2); otherwise it is a single
    VPU add hidden under the neighbouring matmuls."""

    def params(self):
        return ()

    def emit(self, params, a, b):
        return a + b

    def __call__(self, a, b):
        return a + b


class Sequential:
    """JAX/Pallas port of sketchgraphs_models.nn.Sequential.

    Forward semantics are identical to the PyTorch module.  When every module
    exposes params()/emit(), acts row-wise on a 2-D (batch, feature) input,
    and the chain ends in a single array, the whole chain is fused into one
    pallas_call; otherwise it falls back to eager per-module chaining.
    """

    def __init__(self, *args):
        self._sequence_modules = list(args)

    def _fusible(self, args):
        # Row-wise-only assumption: modules must not couple batch rows
        # (no softmax/norm/attention over the batch axis).
        if len(args) != 1 or not hasattr(args[0], "ndim") or args[0].ndim != 2:
            return False
        if not all(hasattr(m, "emit") and hasattr(m, "params")
                   for m in self._sequence_modules):
            return False
        try:
            out = jax.eval_shape(
                lambda xx: _chain_reference(self._sequence_modules, xx),
                args[0])
        except Exception:
            return False
        return not isinstance(out, (list, tuple))

    def __call__(self, *args):
        if self._fusible(args):
            return fused_forward(self._sequence_modules, args[0])
        # Fallback: original eager chaining (per-module dispatch).
        for module in self._sequence_modules:
            if not isinstance(args, (list, tuple)):
                args = [args]
            args = module(*args)
        return args


# ---------------------------------------------------------------------------
# Demo / smoke test
# ---------------------------------------------------------------------------
if __name__ == "__main__":
    key = jax.random.PRNGKey(0)
    k_x, k1, k2, k3 = jax.random.split(key, 4)

    # Lane-dense shapes; hidden=256 keeps the v6e/v7x 256x256 MXU fully fed.
    batch, in_dim, hidden, out_dim = 256, 128, 256, 128

    modules = [
        LinearModule(k1, in_dim, hidden, activation="relu",
                     out_dtype=jnp.bfloat16),
        SplitModule(),   # returns a tuple -> next module gets two args
        AddModule(),     # consumes two args -> folded into next layer's W
        LinearModule(k2, hidden, hidden, activation="relu",
                     out_dtype=jnp.bfloat16),
        LinearModule(k3, hidden, out_dim, activation=None,
                     out_dtype=jnp.float32),
    ]
    seq = Sequential(*modules)

    x = jax.random.normal(k_x, (batch, in_dim), jnp.float32)

    out = jax.block_until_ready(seq(x))

    ref = _chain_reference(modules, x)
    assert out.shape == (batch, out_dim), out.shape
    max_err = float(jnp.max(jnp.abs(out.astype(jnp.float32)
                                    - ref.astype(jnp.float32))))
    assert jnp.allclose(out, ref, atol=3e-2, rtol=3e-2), max_err

    print("KERNEL_OK")
</pallas_src>

<mosaic_0001>
module attributes {stable_mosaic.version = 11 : i64} {
  func.func @_fused_chain_kernel(%arg0: i32, %arg1: memref<128x128xf32, #tpu.memory_space<vmem>>, %arg2: memref<128x256xbf16, #tpu.memory_space<vmem>>, %arg3: memref<1x256xf32, #tpu.memory_space<vmem>>, %arg4: memref<256x256xbf16, #tpu.memory_space<vmem>>, %arg5: memref<1x256xf32, #tpu.memory_space<vmem>>, %arg6: memref<256x128xbf16, #tpu.memory_space<vmem>>, %arg7: memref<1x128xf32, #tpu.memory_space<vmem>>, %arg8: memref<128x128xf32, #tpu.memory_space<vmem>>) attributes {dimension_semantics = [#tpu.dimension_semantics<parallel>], iteration_bounds = array<i64: 2>, scalar_prefetch = 0 : i64, scratch_operands = 0 : i64, tpu.core_type = #tpu.core_type<tc>, window_params = [{transform_indices = @transform_0, window_bounds = array<i64: 128, 128>}, {pipeline_mode = #tpu.pipeline_mode<synchronous>, transform_indices = @transform_1, window_bounds = array<i64: 128, 256>}, {pipeline_mode = #tpu.pipeline_mode<synchronous>, transform_indices = @transform_2, window_bounds = array<i64: 1, 256>}, {pipeline_mode = #tpu.pipeline_mode<synchronous>, transform_indices = @transform_3, window_bounds = array<i64: 256, 256>}, {pipeline_mode = #tpu.pipeline_mode<synchronous>, transform_indices = @transform_4, window_bounds = array<i64: 1, 256>}, {pipeline_mode = #tpu.pipeline_mode<synchronous>, transform_indices = @transform_5, window_bounds = array<i64: 256, 128>}, {pipeline_mode = #tpu.pipeline_mode<synchronous>, transform_indices = @transform_6, window_bounds = array<i64: 1, 128>}, {transform_indices = @transform_7, window_bounds = array<i64: 128, 128>}]} {
    %c0 = arith.constant 0 : index
    %c0_0 = arith.constant 0 : index
    %0 = vector.load %arg1[%c0, %c0_0] : memref<128x128xf32, #tpu.memory_space<vmem>>, vector<128x128xf32>
    %c0_1 = arith.constant 0 : index
    %c0_2 = arith.constant 0 : index
    %1 = vector.load %arg2[%c0_1, %c0_2] : memref<128x256xbf16, #tpu.memory_space<vmem>>, vector<128x256xbf16>
    %c0_3 = arith.constant 0 : index
    %c0_4 = arith.constant 0 : index
    %2 = vector.load %arg3[%c0_3, %c0_4] : memref<1x256xf32, #tpu.memory_space<vmem>>, vector<1x256xf32>
    %3 = arith.truncf %0 : vector<128x128xf32> to vector<128x128xbf16>
    %cst = arith.constant dense<0.000000e+00> : vector<128x256xf32>
    %4 = tpu.matmul %3, %1, %cst {dimension_numbers = #tpu.dot_dimension_numbers<[1], [0], [0], [1], [0, 0, 1, 1], [], []>} : vector<128x128xbf16>, vector<128x256xbf16>, vector<128x256xf32> -> vector<128x256xf32>
    %5 = vector.broadcast %2 : vector<1x256xf32> to vector<128x256xf32>
    %6 = arith.addf %4, %5 : vector<128x256xf32>
    %cst_5 = arith.constant 0.000000e+00 : f32
    %7 = vector.broadcast %cst_5 : f32 to vector<128x256xf32>
    %8 = arith.maximumf %6, %7 : vector<128x256xf32>
    %9 = arith.truncf %8 : vector<128x256xf32> to vector<128x256xbf16>
    %c0_6 = arith.constant 0 : index
    %c0_7 = arith.constant 0 : index
    %10 = vector.load %arg4[%c0_6, %c0_7] : memref<256x256xbf16, #tpu.memory_space<vmem>>, vector<256x256xbf16>
    %c0_8 = arith.constant 0 : index
    %c0_9 = arith.constant 0 : index
    %11 = vector.load %arg5[%c0_8, %c0_9] : memref<1x256xf32, #tpu.memory_space<vmem>>, vector<1x256xf32>
    %cst_10 = arith.constant dense<0.000000e+00> : vector<128x256xf32>
    %12 = tpu.matmul %9, %10, %cst_10 {dimension_numbers = #tpu.dot_dimension_numbers<[1], [0], [0], [1], [0, 0, 1, 1], [], []>} : vector<128x256xbf16>, vector<256x256xbf16>, vector<128x256xf32> -> vector<128x256xf32>
    %13 = vector.broadcast %11 : vector<1x256xf32> to vector<128x256xf32>
    %14 = arith.addf %12, %13 : vector<128x256xf32>
    %cst_11 = arith.constant 0.000000e+00 : f32
    %15 = vector.broadcast %cst_11 : f32 to vector<128x256xf32>
    %16 = arith.maximumf %14, %15 : vector<128x256xf32>
    %17 = arith.truncf %16 : vector<128x256xf32> to vector<128x256xbf16>
    %c0_12 = arith.constant 0 : index
    %c0_13 = arith.constant 0 : index
    %18 = vector.load %arg6[%c0_12, %c0_13] : memref<256x128xbf16, #tpu.memory_space<vmem>>, vector<256x128xbf16>
    %c0_14 = arith.constant 0 : index
    %c0_15 = arith.constant 0 : index
    %19 = vector.load %arg7[%c0_14, %c0_15] : memref<1x128xf32, #tpu.memory_space<vmem>>, vector<1x128xf32>
    %cst_16 = arith.constant dense<0.000000e+00> : vector<128x128xf32>
    %20 = tpu.matmul %17, %18, %cst_16 {dimension_numbers = #tpu.dot_dimension_numbers<[1], [0], [0], [1], [0, 0, 1, 1], [], []>} : vector<128x256xbf16>, vector<256x128xbf16>, vector<128x128xf32> -> vector<128x128xf32>
    %21 = vector.broadcast %19 : vector<1x128xf32> to vector<128x128xf32>
    %22 = arith.addf %20, %21 : vector<128x128xf32>
    %c0_17 = arith.constant 0 : index
    %c0_18 = arith.constant 0 : index
    %23 = vector.load %arg8[%c0_17, %c0_18] : memref<128x128xf32, #tpu.memory_space<vmem>>, vector<128x128xf32>
    tpu.vector_store %arg8[%c0_17, %c0_18], %22 {strides = array<i32>} : memref<128x128xf32, #tpu.memory_space<vmem>>, vector<128x128xf32>,
    return
  }
  func.func @transform_0(%arg0: i32) -> (i32, i32) {
    %c0_i32 = arith.constant 0 : i32
    %c0_i32_0 = arith.constant 0 : i32
    return %arg0, %c0_i32 : i32, i32
  }
  func.func @transform_1(%arg0: i32) -> (i32, i32) {
    %c0_i32 = arith.constant 0 : i32
    %c0_i32_0 = arith.constant 0 : i32
    %c0_i32_1 = arith.constant 0 : i32
    return %c0_i32, %c0_i32_0 : i32, i32
  }
  func.func @transform_2(%arg0: i32) -> (i32, i32) {
    %c0_i32 = arith.constant 0 : i32
    %c0_i32_0 = arith.constant 0 : i32
    %c0_i32_1 = arith.constant 0 : i32
    return %c0_i32, %c0_i32_0 : i32, i32
  }
  func.func @transform_3(%arg0: i32) -> (i32, i32) {
    %c0_i32 = arith.constant 0 : i32
    %c0_i32_0 = arith.constant 0 : i32
    %c0_i32_1 = arith.constant 0 : i32
    return %c0_i32, %c0_i32_0 : i32, i32
  }
  func.func @transform_4(%arg0: i32) -> (i32, i32) {
    %c0_i32 = arith.constant 0 : i32
    %c0_i32_0 = arith.constant 0 : i32
    %c0_i32_1 = arith.constant 0 : i32
    return %c0_i32, %c0_i32_0 : i32, i32
  }
  func.func @transform_5(%arg0: i32) -> (i32, i32) {
    %c0_i32 = arith.constant 0 : i32
    %c0_i32_0 = arith.constant 0 : i32
    %c0_i32_1 = arith.constant 0 : i32
    return %c0_i32, %c0_i32_0 : i32, i32
  }
  func.func @transform_6(%arg0: i32) -> (i32, i32) {
    %c0_i32 = arith.constant 0 : i32
    %c0_i32_0 = arith.constant 0 : i32
    %c0_i32_1 = arith.constant 0 : i32
    return %c0_i32, %c0_i32_0 : i32, i32
  }
  func.func @transform_7(%arg0: i32) -> (i32, i32) {
    %c0_i32 = arith.constant 0 : i32
    %c0_i32_0 = arith.constant 0 : i32
    return %arg0, %c0_i32 : i32, i32
  }
}

module attributes {stable_mosaic.version = 11 : i64} {
  func.func @_fused_chain_kernel(%arg0: i32, %arg1: memref<128x128xf32, #tpu.memory_space<vmem>>, %arg2: memref<128x256xbf16, #tpu.memory_space<vmem>>, %arg3: memref<1x256xf32, #tpu.memory_space<vmem>>, %arg4: memref<256x256xbf16, #tpu.memory_space<vmem>>, %arg5: memref<1x256xf32, #tpu.memory_space<vmem>>, %arg6: memref<256x128xbf16, #tpu.memory_space<vmem>>, %arg7: memref<1x128xf32, #tpu.memory_space<vmem>>, %arg8: memref<128x128xf32, #tpu.memory_space<vmem>>) attributes {dimension_semantics = [#tpu.dimension_semantics<parallel>], iteration_bounds = array<i64: 2>, scalar_prefetch = 0 : i64, scratch_operands = 0 : i64, tpu.core_type = #tpu.core_type<tc>, window_params = [{transform_indices = @transform_0, window_bounds = array<i64: 128, 128>}, {pipeline_mode = #tpu.pipeline_mode<synchronous>, transform_indices = @transform_1, window_bounds = array<i64: 128, 256>}, {pipeline_mode = #tpu.pipeline_mode<synchronous>, transform_indices = @transform_2, window_bounds = array<i64: 1, 256>}, {pipeline_mode = #tpu.pipeline_mode<synchronous>, transform_indices = @transform_3, window_bounds = array<i64: 256, 256>}, {pipeline_mode = #tpu.pipeline_mode<synchronous>, transform_indices = @transform_4, window_bounds = array<i64: 1, 256>}, {pipeline_mode = #tpu.pipeline_mode<synchronous>, transform_indices = @transform_5, window_bounds = array<i64: 256, 128>}, {pipeline_mode = #tpu.pipeline_mode<synchronous>, transform_indices = @transform_6, window_bounds = array<i64: 1, 128>}, {transform_indices = @transform_7, window_bounds = array<i64: 128, 128>}]} {
    %c0 = arith.constant 0 : index
    %c0_0 = arith.constant 0 : index
    %0 = vector.load %arg1[%c0, %c0_0] : memref<128x128xf32, #tpu.memory_space<vmem>>, vector<128x128xf32>
    %c0_1 = arith.constant 0 : index
    %c0_2 = arith.constant 0 : index
    %1 = vector.load %arg2[%c0_1, %c0_2] : memref<128x256xbf16, #tpu.memory_space<vmem>>, vector<128x256xbf16>
    %c0_3 = arith.constant 0 : index
    %c0_4 = arith.constant 0 : index
    %2 = vector.load %arg3[%c0_3, %c0_4] : memref<1x256xf32, #tpu.memory_space<vmem>>, vector<1x256xf32>
    %3 = arith.truncf %0 : vector<128x128xf32> to vector<128x128xbf16>
    %cst = arith.constant dense<0.000000e+00> : vector<128x256xf32>
    %4 = tpu.matmul %3, %1, %cst {dimension_numbers = #tpu.dot_dimension_numbers<[1], [0], [0], [1], [0, 0, 1, 1], [], []>} : vector<128x128xbf16>, vector<128x256xbf16>, vector<128x256xf32> -> vector<128x256xf32>
    %5 = vector.broadcast %2 : vector<1x256xf32> to vector<128x256xf32>
    %6 = arith.addf %4, %5 : vector<128x256xf32>
    %cst_5 = arith.constant 0.000000e+00 : f32
    %7 = vector.broadcast %cst_5 : f32 to vector<128x256xf32>
    %8 = arith.maximumf %6, %7 : vector<128x256xf32>
    %9 = arith.truncf %8 : vector<128x256xf32> to vector<128x256xbf16>
    %c0_6 = arith.constant 0 : index
    %c0_7 = arith.constant 0 : index
    %10 = vector.load %arg4[%c0_6, %c0_7] : memref<256x256xbf16, #tpu.memory_space<vmem>>, vector<256x256xbf16>
    %c0_8 = arith.constant 0 : index
    %c0_9 = arith.constant 0 : index
    %11 = vector.load %arg5[%c0_8, %c0_9] : memref<1x256xf32, #tpu.memory_space<vmem>>, vector<1x256xf32>
    %cst_10 = arith.constant dense<0.000000e+00> : vector<128x256xf32>
    %12 = tpu.matmul %9, %10, %cst_10 {dimension_numbers = #tpu.dot_dimension_numbers<[1], [0], [0], [1], [0, 0, 1, 1], [], []>} : vector<128x256xbf16>, vector<256x256xbf16>, vector<128x256xf32> -> vector<128x256xf32>
    %13 = vector.broadcast %11 : vector<1x256xf32> to vector<128x256xf32>
    %14 = arith.addf %12, %13 : vector<128x256xf32>
    %cst_11 = arith.constant 0.000000e+00 : f32
    %15 = vector.broadcast %cst_11 : f32 to vector<128x256xf32>
    %16 = arith.maximumf %14, %15 : vector<128x256xf32>
    %17 = arith.truncf %16 : vector<128x256xf32> to vector<128x256xbf16>
    %c0_12 = arith.constant 0 : index
    %c0_13 = arith.constant 0 : index
    %18 = vector.load %arg6[%c0_12, %c0_13] : memref<256x128xbf16, #tpu.memory_space<vmem>>, vector<256x128xbf16>
    %c0_14 = arith.constant 0 : index
    %c0_15 = arith.constant 0 : index
    %19 = vector.load %arg7[%c0_14, %c0_15] : memref<1x128xf32, #tpu.memory_space<vmem>>, vector<1x128xf32>
    %cst_16 = arith.constant dense<0.000000e+00> : vector<128x128xf32>
    %20 = tpu.matmul %17, %18, %cst_16 {dimension_numbers = #tpu.dot_dimension_numbers<[1], [0], [0], [1], [0, 0, 1, 1], [], []>} : vector<128x256xbf16>, vector<256x128xbf16>, vector<128x128xf32> -> vector<128x128xf32>
    %21 = vector.broadcast %19 : vector<1x128xf32> to vector<128x128xf32>
    %22 = arith.addf %20, %21 : vector<128x128xf32>
    %c0_17 = arith.constant 0 : index
    %c0_18 = arith.constant 0 : index
    %23 = vector.load %arg8[%c0_17, %c0_18] : memref<128x128xf32, #tpu.memory_space<vmem>>, vector<128x128xf32>
    tpu.vector_store %arg8[%c0_17, %c0_18], %22 {strides = array<i32>} : memref<128x128xf32, #tpu.memory_space<vmem>>, vector<128x128xf32>,
    return
  }
  func.func @transform_0(%arg0: i32) -> (i32, i32) {
    %c0_i32 = arith.constant 0 : i32
    %c0_i32_0 = arith.constant 0 : i32
    return %arg0, %c0_i32 : i32, i32
  }
  func.func @transform_1(%arg0: i32) -> (i32, i32) {
    %c0_i32 = arith.constant 0 : i32
    %c0_i32_0 = arith.constant 0 : i32
    %c0_i32_1 = arith.constant 0 : i32
    return %c0_i32, %c0_i32_0 : i32, i32
  }
  func.func @transform_2(%arg0: i32) -> (i32, i32) {
    %c0_i32 = arith.constant 0 : i32
    %c0_i32_0 = arith.constant 0 : i32
    %c0_i32_1 = arith.constant 0 : i32
    return %c0_i32, %c0_i32_0 : i32, i32
  }
  func.func @transform_3(%arg0: i32) -> (i32, i32) {
    %c0_i32 = arith.constant 0 : i32
    %c0_i32_0 = arith.constant 0 : i32
    %c0_i32_1 = arith.constant 0 : i32
    return %c0_i32, %c0_i32_0 : i32, i32
  }
  func.func @transform_4(%arg0: i32) -> (i32, i32) {
    %c0_i32 = arith.constant 0 : i32
    %c0_i32_0 = arith.constant 0 : i32
    %c0_i32_1 = arith.constant 0 : i32
    return %c0_i32, %c0_i32_0 : i32, i32
  }
  func.func @transform_5(%arg0: i32) -> (i32, i32) {
    %c0_i32 = arith.constant 0 : i32
    %c0_i32_0 = arith.constant 0 : i32
    %c0_i32_1 = arith.constant 0 : i32
    return %c0_i32, %c0_i32_0 : i32, i32
  }
  func.func @transform_6(%arg0: i32) -> (i32, i32) {
    %c0_i32 = arith.constant 0 : i32
    %c0_i32_0 = arith.constant 0 : i32
    %c0_i32_1 = arith.constant 0 : i32
    return %c0_i32, %c0_i32_0 : i32, i32
  }
  func.func @transform_7(%arg0: i32) -> (i32, i32) {
    %c0_i32 = arith.constant 0 : i32
    %c0_i32_0 = arith.constant 0 : i32
    return %arg0, %c0_i32 : i32, i32
  }
}

</mosaic_0001>

<bundles_post_ra>
// kernel: tpu_custom_call.1
= control target key start
LH: loop header
LB: loop body
LE: loop exit
PB: predicated region body
PF: predicated region fallthrough
CT: control target
= control target key end

     0   :  { %12 = vsyncpa [#allocation3], 0  ;;  %s2399_s0 = inlined_call_operand.hbm [shape: f32[256,128], index: 0, kind: input, shape index: {}]   ;;  %s2400_s1 = inlined_call_operand.hbm [shape: bf16[128,256], index: 1, kind: input, shape index: {}]   ;;  %s2401_s2 = inlined_call_operand.vmem [shape: f32[1,256], index: 2, kind: input, shape index: {}]   ;;  %s2402_s3 = inlined_call_operand.hbm [shape: bf16[256,256], index: 3, kind: input, shape index: {}]   ;;  %s2403_s4 = inlined_call_operand.vmem [shape: f32[1,256], index: 4, kind: input, shape index: {}]   ;;  %s2404_s5 = inlined_call_operand.hbm [shape: bf16[256,128], index: 5, kind: input, shape index: {}]   ;;  %s2405_s6 = inlined_call_operand.vmem [shape: f32[1,128], index: 6, kind: input, shape index: {}]   ;;  %s2406_s7 = inlined_call_operand.hbm [shape: f32[256,128], index: 7, kind: output, shape index: {}]  }
   0x1   :  { %14 = vsyncpa [#allocation3 + $0x1], 0 }
   0x2   :  { %15 = vsyncpa [#allocation6], 0 }
   0x3   :  { %16 = vsyncpa [#allocation9], 0 }
   0x4   :  { %17 = vsyncpa [#allocation4], 0 }
   0x5   :  { %19 = vsyncpa [#allocation4 + $0x1], 0  ;;  %s1947_s24 = smov 0   ;;  %s1949_s25 = smov 0  }
   0x6   :  { %s1951_s26 = smov 0   ;;  %s1953_s27 = smov 0  }
   0x7 LB: > { %s1968_s28 = sadd.s32 4294967295, %s1893_s27   ;;  %s1366_s29 = sadd.s32 4294967294, %s1893_s27   ;;  %s1893_s27 = sphi %s1953_s27, %s2432_s27   ;;  %s1889_s26 = sphi %s1951_s26, %s2431_s26   ;;  %s1885_s25 = sphi %s1949_s25, %s2430_s25   ;;  %s1881_s24 = sphi %s1947_s24, %s2429_s24  }
   0x8   : > { %p45_p0 = scmp.ne.s32.totalorder %s1885_s25, %s1881_s24  ;;  %p2407_p1 = scmp.eq.s32.totalorder %s1968_s28, 0 }
   0x9   : > { %p201_p3 = scmp.eq.s32.totalorder %s1366_s29, 1  ;;  %p1367_p5 = scmp.ge.s32.totalorder %s1893_s27, 1 }
   0xa   : > { %p1977_p4 = por %p2407_p1, %p45_p0  ;;  %p208_p7 = scmp.lt.s32.totalorder %s1893_s27, 3 }
   0xb   : > { %p1982_p6 = por %p201_p3, %p45_p0  ;;  %s1895_s10 = smov [#allocation5]  }
   0xc   : > { %s2411_s30 = scalar_select %p1977_p4, 1, 0 }
   0xd   : > { %s2412_s8 = scalar_select %p1982_p6, 1, 0 }
   0xe   : > { %p1987_p8 = pnand %p1367_p5, %p208_p7  ;;  %s220_s11 = sshll.u32 %s1895_s10, 4  ;;  %s1991_s11 = int_to_ptr.vmem [resolvable:$true] %s220_s11 }
   0xf   : > { %2413 = sst [smem:[#allocation15_spill]] %s2412_s8  ;;  %s1896_s13 = smov [#allocation7]  }
  0x10   : > { %s2414_s9 = scalar_select %p1987_p8, 1, 0 }
  0x11   : > { %p1549_p9 = pneg %p1987_p8  ;;  %s236_s14 = sshll.u32 %s1896_s13, 4  ;;  %s2002_s14 = int_to_ptr.vmem [resolvable:$true] %s236_s14 }
  0x12   : > { %s1897_s15 = smov [#allocation8]   ;;  %s1705_s19 = scalar_lea.hbm %s2400_s1, 2048 }
  0x13   : > { %p1998_p11 = pnand %p1549_p9, %p2407_p1  ;;  %s2004_s16 = sshll.u32 %s1897_s15, 4  ;;  %s253_s16 = int_to_ptr.vmem [resolvable:$true] %s2004_s16 }
  0x14   : > { %p1706_p12 = scmp.ne.s32.totalorder %s2400_s1, %s1705_s19  ;;  %p1712_p5 = scmp.lt.u32.totalorder %s1705_s19, %s2400_s1 }
  0x15   : > { %p2014_p13 = pneg %p1998_p11 }
  0x17   : > { %p1708_p0 = pnand %p2014_p13, %p1706_p12 }
  0x19   : > { %p1709_p3 = pneg %p1708_p0 }
  0x1b   : > { %p1714_p7 = pnand %p1712_p5, %p1709_p3 }
  0x1d   : > { %1717 = shalt.err (!%p1714_p7)
}
  0x1e   : > { %s1718_s10 = scalar_lea.vmem %s1991_s11, 2048  ;;  %p1726_p2 = scmp.lt.s32.totalorder %s1991_s11, %s1991_s11 }
  0x1f   : > { %p1719_p9 = scmp.ne.s32.totalorder %s1991_s11, %s1718_s10  ;;  %p1727_p6 = scmp.lt.s32.totalorder %s1718_s10, %s1718_s10 }
  0x21   : > { %p1721_p10 = pnand %p1719_p9, %p2014_p13  ;;  %p1728_p12 = por %p1727_p6, %p1726_p2 }
  0x23   : > { %p1722_p1 = pneg %p1721_p10 }
  0x25   : > { %p1729_p0 = pnand %p1728_p12, %p1722_p1 }
  0x27   : > { %1732 = shalt.err (!%p1729_p0)
}
  0x28   : > { %s1898_s13 = smov 128   ;;  %s1899_s15 = smov 8  }
  0x29   : > { %1552 = dma.hbm_to_vmem [thread:$0]  (!%p1998_p11), %s2400_s1, 2048, %s1991_s11, [#allocation6], %s1898_s13, %s1898_s13, %s1899_s15  }
  0x2a   : > { %s1733_s21 = scalar_lea.hbm %s2402_s3, 4096 }
  0x2b   : > { %p1734_p1 = scmp.ne.s32.totalorder %s2402_s3, %s1733_s21  ;;  %p1740_p10 = scmp.lt.u32.totalorder %s1733_s21, %s2402_s3 }
  0x2d   : > { %p1736_p2 = pnand %p1734_p1, %p2014_p13 }
  0x2f   : > { %p1737_p6 = pneg %p1736_p2 }
  0x31   : > { %p1742_p3 = pnand %p1740_p10, %p1737_p6 }
  0x33   : > { %1745 = shalt.err (!%p1742_p3)
}
  0x34   : > { %s1746_s11 = scalar_lea.vmem %s2002_s14, 4096  ;;  %p1754_p12 = scmp.lt.s32.totalorder %s2002_s14, %s2002_s14 }
  0x35   : > { %p1747_p5 = scmp.ne.s32.totalorder %s2002_s14, %s1746_s11  ;;  %p1755_p0 = scmp.lt.s32.totalorder %s1746_s11, %s1746_s11 }
  0x37   : > { %p1749_p7 = pnand %p1747_p5, %p2014_p13  ;;  %p1756_p1 = por %p1755_p0, %p1754_p12 }
  0x39   : > { %p1750_p9 = pneg %p1749_p7 }
  0x3b   : > { %p1757_p2 = pnand %p1756_p1, %p1750_p9 }
  0x3d   : > { %1760 = shalt.err (!%p1757_p2)
}
  0x3e   : > { %1555 = dma.hbm_to_vmem [thread:$0]  (!%p1998_p11), %s2402_s3, 4096, %s2002_s14, [#allocation6], %s1898_s13, %s1898_s13, %s1899_s15  }
  0x3f   : > { %s1761_s20 = scalar_lea.hbm %s2404_s5, 2048 }
  0x40   : > { %p1762_p6 = scmp.ne.s32.totalorder %s2404_s5, %s1761_s20  ;;  %p1768_p5 = scmp.lt.u32.totalorder %s1761_s20, %s2404_s5 }
  0x42   : > { %p1764_p10 = pnand %p1762_p6, %p2014_p13 }
  0x44   : > { %p1765_p3 = pneg %p1764_p10 }
  0x46   : > { %p1770_p7 = pnand %p1768_p5, %p1765_p3 }
  0x48   : > { %1773 = shalt.err (!%p1770_p7)
}
  0x49   : > { %s1774_s11 = scalar_lea.vmem %s253_s16, 2048  ;;  %p1782_p1 = scmp.lt.s32.totalorder %s253_s16, %s253_s16 }
  0x4a   : > { %p1775_p9 = scmp.ne.s32.totalorder %s253_s16, %s1774_s11  ;;  %p1783_p2 = scmp.lt.s32.totalorder %s1774_s11, %s1774_s11 }
  0x4c   : > { %p1777_p12 = pnand %p1775_p9, %p2014_p13  ;;  %p1784_p4 = por %p1783_p2, %p1782_p1 }
  0x4e   : > { %p1778_p0 = pneg %p1777_p12 }
  0x50   : > { %p1785_p8 = pnand %p1784_p4, %p1778_p0 }
  0x52   : > { %1788 = shalt.err (!%p1785_p8)
}
  0x53   : > { %s1900_s14 = smov 64   ;;  %s1901_s22 = smov 4  }
  0x54   : > { %1558 = dma.hbm_to_vmem [thread:$0]  (!%p1998_p11), %s2404_s5, 2048, %s253_s16, [#allocation9], %s1900_s14, %s1900_s14, %s1901_s22  }
  0x55   : > { %s2084_s18 = sadd.s32 1, %s1893_s27   ;;  %s32_s20 = sadd.s32 1, %s1889_s26 }
  0x56   : > { %s29_s19 = ssub.s32 %s1893_s27, %s2084_s18  ;;  %p39_p8 = scmp.ne.s32.totalorder %s1889_s26, %s1885_s25 }
  0x57   : > { %p30_p4 = scmp.eq.s32.totalorder %s29_s19, 0  ;;  %p40_p13 = scmp.eq.s32.totalorder %s1893_s27, 0 }
  0x58   : > { %p1570_p6 = scmp.lt.s32.totalorder %s1893_s27, 2  ;;  %p2417_p3 = scmp.eq.s32.totalorder %s1968_s28, 1 }
  0x59   : > { %s2094_s21 = scalar_select %p30_p4, %s1889_s26, %s32_s20  }
  0x5a   : > { %p41_p10 = por %p40_p13, %p39_p8  ;;  %p2098_p5 = por %p2417_p3, %p39_p8 }
  0x5b   : > { %s269_s12 = sand.u32 1, %s1889_s26   ;;  %s1451_s29 = sshll.u32 %s1893_s27, 11 }
  0x5c   : > { %s1372_s16 = sshll.u32 %s269_s12, 7  ;;  %s2107_s14 = scalar_lea.hbm %s2399_s0, %s1451_s29 }
  0x5d   : > { %s273_s22 = scalar_lea.vmem [#allocation2], %s1372_s16  ;;  %p2109_p11 = pnand %p1570_p6, %p41_p10 }
  0x5e   : > { %s280_s8 = sshll.u32 %s273_s22, 4  ;;  %s2115_s19 = scalar_lea.sflag [#allocation3], %s269_s12  ;;  %s2113_s8 = int_to_ptr.vmem [resolvable:$true] %s280_s8 }
  0x5f   : > { %s1789_s20 = scalar_lea.hbm %s2107_s14, 2048  ;;  %p1791_p9 = pneg %p2109_p11 }
  0x60   : > { %p1790_p7 = scmp.ne.s32.totalorder %s2107_s14, %s1789_s20  ;;  %s1794_s10 = scalar_lea.hbm %s2399_s0, 4096 }
  0x61   : > { %p1795_p1 = scmp.lt.u32.totalorder %s2107_s14, %s2399_s0  ;;  %p1796_p2 = scmp.lt.u32.totalorder %s1794_s10, %s1789_s20 }
  0x62   : > { %p1792_p12 = pnand %p1791_p9, %p1790_p7  ;;  %p1798_p8 = scmp.lt.u32.totalorder %s1789_s20, %s2107_s14 }
  0x63   : > { %p1797_p4 = por %p1796_p2, %p1795_p1 }
  0x64   : > { %p1793_p0 = pneg %p1792_p12 }
  0x65   : > { %p1799_p13 = por %p1798_p8, %p1797_p4 }
  0x67   : > { %p1800_p6 = pnand %p1799_p13, %p1793_p0 }
  0x69   : > { %1803 = shalt.err (!%p1800_p6)
}
  0x6a   : > { %s1804_s12 = scalar_lea.vmem %s2113_s8, 2048  ;;  %s1902_s29 = smov [#allocation2]  }
  0x6b   : > { %p1805_p10 = scmp.ne.s32.totalorder %s2113_s8, %s1804_s12  ;;  %s1809_s16 = sshll.u32 %s1902_s29, 4  ;;  %s1810_s16 = int_to_ptr.vmem [resolvable:$false] %s1809_s16 }
  0x6c   : > { %s1811_s11 = scalar_lea.vmem %s1810_s16, 4096  ;;  %p1812_p12 = scmp.lt.s32.totalorder %s2113_s8, %s1810_s16 }
  0x6d   : > { %p1807_p3 = pnand %p1805_p10, %p1791_p9  ;;  %p1813_p1 = scmp.lt.s32.totalorder %s1811_s11, %s1804_s12 }
  0x6f   : > { %p1808_p7 = pneg %p1807_p3  ;;  %p1814_p2 = por %p1813_p1, %p1812_p12 }
  0x71   : > { %p1815_p4 = pnand %p1814_p2, %p1808_p7 }
  0x73   : > { %1818 = shalt.err (!%p1815_p4)
}
  0x74   : > { %1562 = dma.hbm_to_vmem [thread:$0]  (!%p2109_p11), %s2107_s14, 2048, %s2113_s8, %s2115_s19, %s1898_s13, %s1898_s13, %s1899_s15  }
  0x75   : > { %p2420_p9 = scmp.ne.s32.totalorder %s2414_s9, 0 }
  0x76   : > { %s2149_s20 = sand.u32 (!%p2420_p9), 1, %s1885_s25   ;;  %p2421_p0 = scmp.ne.s32.totalorder (!%p2420_p9), %s2411_s30, 0 }
  0x77   : > { %292 = sbr.rel (%p2420_p9) target bundleno = 901 (0x385), region = 48  ;;  %s1376_s10 = sshll.u32 (!%p2420_p9), %s2149_s20, 7 }
  0x78   : > { %s295_s22 = scalar_lea.sflag (!%p2420_p9), [#allocation3], %s2149_s20  ;;  %s2155_s17 = scalar_lea.vmem (!%p2420_p9), [#allocation2], %s1376_s10 }
  0x7e   : > { %1864 = dma.done.wait (%p2421_p0), %s295_s22, 2048  }
  0x7f   : > { %1866 = vsyncadd (%p2421_p0), %s295_s22, 4294965248  ;;  %p2422_p11 = scmp.eq.s32.totalorder %s1968_s28, 0 }
  0x81   : > { %1868 = dma.done.wait (%p2422_p11), [#allocation6], 6144   ;;  %p2423_p8 = pmov %p2422_p11 }
  0x83   : > { %1870 = vsyncadd (%p2423_p8), [#allocation6], 4294961152  ;;  %p2424_p13 = pmov %p2423_p8 }
  0x84   : > { %p2425_p6 = pmov %p2423_p8 }
  0x85   : > { %1872 = dma.done.wait (%p2424_p13), [#allocation9], 2048  }
  0x86   : > { %1874 = vsyncadd (%p2425_p6), [#allocation9], 4294965248  ;;  %v1903_v0 = vmov 0   ;;  %v1617_v1 = vld [vmem:[#allocation5 + $0x4] ss:$8 sps:$4 sm:$0xff]   ;;  %v346_v31 = vld [vmem:[%s2155_s17 + $0x10] sm:$0xff] }
  0x87   : > { %508 = vmatprep.mubr.bf16.mxu0 %v1903_v0  ;;  %v1619_v2 = vld [vmem:[#allocation5] ss:$8 sps:$4 sm:$0xff]   ;;  %476 = vmatprep.subr.bf16.mxu0 %v1617_v1  ;;  %v1620_v3 = vld [vmem:[#allocation5 + $0x14] ss:$8 sps:$4 sm:$0xff]   ;;  %v1622_v4 = vld [vmem:[#allocation5 + $0x10] ss:$8 sps:$4 sm:$0xff]  }
  0x88   : > { %477 = vmatpush1.bf16.msra.mxu0 %v1619_v2  ;;  %v1623_v5 = vld [vmem:[#allocation5 + $0x24] ss:$8 sps:$4 sm:$0xff]   ;;  %v1625_v6 = vld [vmem:[#allocation5 + $0x20] ss:$8 sps:$4 sm:$0xff]   ;;  %v1626_v7 = vld [vmem:[#allocation5 + $0x34] ss:$8 sps:$4 sm:$0xff]  }
  0x89   : > { %478 = vmatprep.subr.bf16.mxu0 %v1620_v3  ;;  %v1628_v8 = vld [vmem:[#allocation5 + $0x30] ss:$8 sps:$4 sm:$0xff]   ;;  %v1629_v9 = vld [vmem:[#allocation5 + $0x44] ss:$8 sps:$4 sm:$0xff]   ;;  %v1631_v10 = vld [vmem:[#allocation5 + $0x40] ss:$8 sps:$4 sm:$0xff]  }
  0x8a   : > { %v1632_v11 = vld [vmem:[#allocation5 + $0x54] ss:$8 sps:$4 sm:$0xff]   ;;  %v1641_v12 = vld [vmem:[#allocation7 + $0x4] ss:$8 sps:$4 sm:$0xff]   ;;  %v1643_v13 = vld [vmem:[#allocation7] ss:$8 sps:$4 sm:$0xff]  }
  0x8b   : > { %v1634_v14 = vld [vmem:[#allocation5 + $0x50] ss:$8 sps:$4 sm:$0xff]   ;;  %841 = vmatprep.subr.bf16.mxu1 %v1641_v12  ;;  %v1644_v15 = vld [vmem:[#allocation7 + $0x14] ss:$8 sps:$4 sm:$0xff]   ;;  %v1635_v16 = vld [vmem:[#allocation5 + $0x64] ss:$8 sps:$4 sm:$0xff]  }
  0x8c   : > { %479 = vmatpush1.bf16.msra.mxu0 %v1622_v4  ;;  %842 = vmatpush1.bf16.msra.mxu1 %v1643_v13  ;;  %v1646_v17 = vld [vmem:[#allocation7 + $0x10] ss:$8 sps:$4 sm:$0xff]   ;;  %v1647_v18 = vld [vmem:[#allocation7 + $0x24] ss:$8 sps:$4 sm:$0xff]   ;;  %v1637_v19 = vld [vmem:[#allocation5 + $0x60] ss:$8 sps:$4 sm:$0xff]  }
  0x8d   : > { %480 = vmatprep.subr.bf16.mxu0 %v1623_v5  ;;  %843 = vmatprep.subr.bf16.mxu1 %v1644_v15  ;;  %v1638_v20 = vld [vmem:[#allocation5 + $0x74] ss:$8 sps:$4 sm:$0xff]   ;;  %v1649_v21 = vld [vmem:[#allocation7 + $0x20] ss:$8 sps:$4 sm:$0xff]   ;;  %v1640_v23 = vld [vmem:[#allocation5 + $0x70] ss:$8 sps:$4 sm:$0xff]  }
  0x8e   : > { %v1650_v22 = vld [vmem:[#allocation7 + $0x34] ss:$8 sps:$4 sm:$0xff]   ;;  %v344_v24 = vld [vmem:[%s2155_s17] sm:$0xff]  ;;  %v345_v25 = vld [vmem:[%s2155_s17 + $0x8] sm:$0xff]  ;;  %s2315_s19 = scalar_lea.vmem [#allocation10], %s1376_s10  ;;  %s1452_s12 = sshll.u32 %s1968_s28, 11 }
  0x8f   : > { %v1652_v26 = vld [vmem:[#allocation7 + $0x30] ss:$8 sps:$4 sm:$0xff]   ;;  %v1653_v27 = vld [vmem:[#allocation7 + $0x44] ss:$8 sps:$4 sm:$0xff]   ;;  %v377_v28 = vpack.c.bf16 %v345_v25, %v344_v24  ;;  %v1655_v29 = vld [vmem:[#allocation7 + $0x40] ss:$8 sps:$4 sm:$0xff]   ;;  %s2350_s10 = scalar_lea.hbm %s2406_s7, %s1452_s12 }
  0x90   : > { %481 = vmatpush1.bf16.msra.mxu0 %v1625_v6  ;;  %844 = vmatpush1.bf16.msra.mxu1 %v1646_v17  ;;  %v1656_v30 = vld [vmem:[#allocation7 + $0x54] ss:$8 sps:$4 sm:$0xff]   ;;  %v1658_v33 = vld [vmem:[#allocation7 + $0x50] ss:$8 sps:$4 sm:$0xff]   ;;  %v1659_v34 = vld [vmem:[#allocation7 + $0x64] ss:$8 sps:$4 sm:$0xff]  }
  0x91   : > { %482 = vmatprep.subr.bf16.mxu0 %v1626_v7  ;;  %845 = vmatprep.subr.bf16.mxu1 %v1647_v18  ;;  %v347_v32 = vld [vmem:[%s2155_s17 + $0x18] sm:$0xff]  ;;  %v1661_v35 = vld [vmem:[#allocation7 + $0x60] ss:$8 sps:$4 sm:$0xff]   ;;  %v1665_v41 = vld [vmem:[#allocation7 + $0x84] ss:$8 sps:$4 sm:$0xff]   ;;  %s1264_s29 = sshll.u32 %s2315_s19, 4  ;;  %s2352_s29 = int_to_ptr.vmem [resolvable:$true] %s1264_s29 }
  0x92   : > { %v378_v36 = vpack.c.bf16 %v347_v32, %v346_v31  ;;  %v1662_v37 = vld [vmem:[#allocation7 + $0x74] ss:$8 sps:$4 sm:$0xff]   ;;  %v348_v38 = vld [vmem:[%s2155_s17 + $0x20] sm:$0xff]  ;;  %v349_v39 = vld [vmem:[%s2155_s17 + $0x28] sm:$0xff]  ;;  %s1251_s28 = scalar_lea.sflag [#allocation4], %s2149_s20  ;;  %s1819_s22 = scalar_lea.vmem %s2352_s29, 2048 }
  0x93   : > { %v1664_v40 = vld [vmem:[#allocation7 + $0x70] ss:$8 sps:$4 sm:$0xff]   ;;  %v379_v42 = vpack.c.bf16 %v349_v39, %v348_v38  ;;  %v1667_v43 = vld [vmem:[#allocation7 + $0x80] ss:$8 sps:$4 sm:$0xff]   ;;  %v1668_v44 = vld [vmem:[#allocation7 + $0x94] ss:$8 sps:$4 sm:$0xff]   ;;  %p1820_p10 = scmp.ne.s32.totalorder %s2352_s29, %s1819_s22 }
  0x94   : > { %483 = vmatpush1.bf16.msra.mxu0 %v1628_v8  ;;  %846 = vmatpush1.bf16.msra.mxu1 %v1649_v21  ;;  %v350_v45 = vld [vmem:[%s2155_s17 + $0x30] sm:$0xff]  ;;  %v351_v46 = vld [vmem:[%s2155_s17 + $0x38] sm:$0xff]  ;;  %v1671_v48 = vld [vmem:[#allocation7 + $0xa4] ss:$8 sps:$4 sm:$0xff]  }
  0x95   : > { %484 = vmatprep.subr.bf16.mxu0 %v1629_v9  ;;  %847 = vmatprep.subr.bf16.mxu1 %v1650_v22  ;;  %v1670_v47 = vld [vmem:[#allocation7 + $0x90] ss:$8 sps:$4 sm:$0xff]   ;;  %v380_v49 = vpack.c.bf16 %v351_v46, %v350_v45  ;;  %v1673_v50 = vld [vmem:[#allocation7 + $0xa0] ss:$8 sps:$4 sm:$0xff]   ;;  %v1674_v51 = vld [vmem:[#allocation7 + $0xb4] ss:$8 sps:$4 sm:$0xff]   ;;  %p1821_p3 = pnand %p1820_p10, %p2098_p5 }
  0x96   : > { %v352_v52 = vld [vmem:[%s2155_s17 + $0x40] sm:$0xff]  ;;  %v353_v53 = vld [vmem:[%s2155_s17 + $0x48] sm:$0xff]  ;;  %v1676_v54 = vld [vmem:[#allocation7 + $0xb0] ss:$8 sps:$4 sm:$0xff]  }
  0x97   : > { %v1677_v55 = vld [vmem:[#allocation7 + $0xc4] ss:$8 sps:$4 sm:$0xff]   ;;  %v381_v56 = vpack.c.bf16 %v353_v53, %v352_v52  ;;  %v1679_v57 = vld [vmem:[#allocation7 + $0xc0] ss:$8 sps:$4 sm:$0xff]   ;;  %v1680_v58 = vld [vmem:[#allocation7 + $0xd4] ss:$8 sps:$4 sm:$0xff]   ;;  %p1822_p7 = pneg %p1821_p3 }
  0x98   : > { %485 = vmatpush1.bf16.msra.mxu0 %v1631_v10  ;;  %848 = vmatpush1.bf16.msra.mxu1 %v1652_v26  ;;  %v354_v59 = vld [vmem:[%s2155_s17 + $0x50] sm:$0xff]  ;;  %v355_v60 = vld [vmem:[%s2155_s17 + $0x58] sm:$0xff]  ;;  %v356_v62 = vld [vmem:[%s2155_s17 + $0x60] sm:$0xff] }
  0x99   : > { %486 = vmatprep.subr.bf16.mxu0 %v1632_v11  ;;  %849 = vmatprep.subr.bf16.mxu1 %v1653_v27  ;;  %v382_v61 = vpack.c.bf16 %v355_v60, %v354_v59  ;;  %v357_v63 = vld [vmem:[%s2155_s17 + $0x68] sm:$0xff]  ;;  %v358_v2 = vld [vmem:[%s2155_s17 + $0x70] sm:$0xff]  ;;  %v359_v3 = vld [vmem:[%s2155_s17 + $0x78] sm:$0xff]  ;;  %s1904_s17 = smov [#allocation10]  }
  0x9a   : > { %v383_v1 = vpack.c.bf16 %v357_v63, %v356_v62  ;;  %v384_v4 = vpack.c.bf16 %v359_v3, %v358_v2  ;;  %v1682_v5 = vld [vmem:[#allocation7 + $0xd0] ss:$8 sps:$4 sm:$0xff]   ;;  %v1683_v6 = vld [vmem:[#allocation7 + $0xe4] ss:$8 sps:$4 sm:$0xff]   ;;  %v1685_v7 = vld [vmem:[#allocation7 + $0xe0] ss:$8 sps:$4 sm:$0xff]  }
  0x9b   : > { %v1686_v8 = vld [vmem:[#allocation7 + $0xf4] ss:$8 sps:$4 sm:$0xff]   ;;  %v1688_v9 = vld [vmem:[#allocation7 + $0xf0] ss:$8 sps:$4 sm:$0xff]   ;;  %v1689_v10 = vld [vmem:[#allocation8 + $0x40] sm:$0xff]   ;;  %s1823_s30 = sshll.u32 %s1904_s17, 4  ;;  %s1824_s30 = int_to_ptr.vmem [resolvable:$false] %s1823_s30 }
  0x9c   : > { %487 = vmatpush1.bf16.msra.mxu0 %v1634_v14  ;;  %850 = vmatpush1.bf16.msra.mxu1 %v1655_v29  ;;  %v1690_v11 = vld [vmem:[#allocation8] sm:$0xff]   ;;  %v1691_v12 = vld [vmem:[#allocation8 + $0x48] sm:$0xff]   ;;  %v1693_v13 = vld [vmem:[#allocation8 + $0x50] sm:$0xff]   ;;  %s1825_s9 = scalar_lea.vmem %s1824_s30, 4096  ;;  %p1826_p12 = scmp.lt.s32.totalorder %s2352_s29, %s1824_s30 }
  0x9d   : > { %488 = vmatprep.subr.bf16.mxu0 %v1635_v16  ;;  %851 = vmatprep.subr.bf16.mxu1 %v1656_v30  ;;  %v2193_v14 = vld [vmem:[#allocation8 + $0x10] sm:$0xff]   ;;  %v2195_v15 = vld [vmem:[#allocation8 + $0x58] sm:$0xff]   ;;  %v2201_v17 = vld [vmem:[#allocation8 + $0x60] sm:$0xff]   ;;  %p1827_p1 = scmp.lt.s32.totalorder %s1825_s9, %s1819_s22 }
  0x9e   : > { %v2198_v16 = vld [vmem:[#allocation8 + $0x18] sm:$0xff]   ;;  %v2204_v18 = vld [vmem:[#allocation8 + $0x20] sm:$0xff]  }
  0x9f   : > { %p1828_p2 = por %p1827_p1, %p1826_p12 }
  0xa0   : > { %489 = vmatpush1.bf16.msra.mxu0 %v1637_v19  ;;  %852 = vmatpush1.bf16.msra.mxu1 %v1658_v33  ;;  %v2207_v19 = vld [vmem:[#allocation8 + $0x68] sm:$0xff]  }
  0xa1   : > { %490 = vmatprep.subr.bf16.mxu0 %v1638_v20  ;;  %853 = vmatprep.subr.bf16.mxu1 %v1659_v34  ;;  %v386_v20 = vlaneseq  ;;  %p1829_p4 = pnand %p1828_p2, %p1822_p7 }
  0xa3   : > { %v2211_v21 = vshrl.u32 %v386_v20, 7 }
  0xa4   : > { %491 = vmatpush1.bf16.msra.mxu0 %v1640_v23  ;;  %854 = vmatpush1.bf16.msra.mxu1 %v1661_v35  ;;  %v376_v23 = vld [vmem:[%s2401_s2] sm:$0x3] }
  0xa5   : > { %855 = vmatprep.subr.bf16.mxu1 %v1662_v37  ;;  %1453 = vmatprep.subr.bf16.mxu0 %v1689_v10  ;;  %v388_v22 = vsub.s32 0, %v2211_v21  ;;  %v392_v24 = vsub.s32 1, %v2211_v21 }
  0xa7   : > { %509 = vmatmul.mubr.bf16.vlgmr.msra.gmra.mrb[0].mxu0 %v377_v28  ;;  %v2220_v25 = vrot.slane %v376_v23, %v388_v22  ;;  %v2224_v26 = vrot.slane %v376_v23, %v392_v24 }
  0xa8   : > { %518 = vmatprep.mubr.bf16.mxu0 %v1903_v0  ;;  %856 = vmatpush1.bf16.msra.mxu1 %v1664_v40 }
  0xa9   : > { %857 = vmatprep.subr.bf16.mxu1 %v1665_v41  ;;  %1454 = vmatpush3.bf16.msra.mxu0 %v1690_v11 }
  0xaa   : > { %1455 = vmatprep.subr.bf16.mxu0 %v1691_v12 }
  0xac   : > { %858 = vmatpush1.bf16.msra.mxu1 %v1667_v43 }
  0xad   : > { %859 = vmatprep.subr.bf16.mxu1 %v1668_v44 }
  0xaf   : > { %519 = vmatmul.mubr.bf16.gmra.mrb[4].mxu0 %v378_v36 }
  0xb0   : > { %528 = vmatprep.mubr.bf16.mxu0 %v1903_v0  ;;  %860 = vmatpush1.bf16.msra.mxu1 %v1670_v47 }
  0xb1   : > { %861 = vmatprep.subr.bf16.mxu1 %v1671_v48 }
  0xb4   : > { %862 = vmatpush1.bf16.msra.mxu1 %v1673_v50 }
  0xb5   : > { %863 = vmatprep.subr.bf16.mxu1 %v1674_v51 }
  0xb7   : > { %529 = vmatmul.mubr.bf16.gmra.mrb[8].mxu0 %v379_v42 }
  0xb8   : > { %538 = vmatprep.mubr.bf16.mxu0 %v1903_v0  ;;  %864 = vmatpush1.bf16.msra.mxu1 %v1676_v54 }
  0xb9   : > { %865 = vmatprep.subr.bf16.mxu1 %v1677_v55 }
  0xbc   : > { %866 = vmatpush1.bf16.msra.mxu1 %v1679_v57 }
  0xbd   : > { %867 = vmatprep.subr.bf16.mxu1 %v1680_v58 }
  0xbf   : > { %539 = vmatmul.mubr.bf16.gmra.mrb[12].mxu0 %v380_v49 }
  0xc0   : > { %548 = vmatprep.mubr.bf16.mxu0 %v1903_v0  ;;  %868 = vmatpush1.bf16.msra.mxu1 %v1682_v5 }
  0xc1   : > { %869 = vmatprep.subr.bf16.mxu1 %v1683_v6 }
  0xc4   : > { %870 = vmatpush1.bf16.msra.mxu1 %v1685_v7 }
  0xc5   : > { %871 = vmatprep.subr.bf16.mxu1 %v1686_v8 }
  0xc7   : > { %549 = vmatmul.mubr.bf16.gmra.mrb[16].mxu0 %v381_v56 }
  0xc8   : > { %558 = vmatprep.mubr.bf16.mxu0 %v1903_v0  ;;  %872 = vmatpush1.bf16.msra.mxu1 %v1688_v9 }
  0xc9   : > { %1517 = vmatprep.subr.bf16.mxu1 %v1689_v10 }
  0xcf   : > { %559 = vmatmul.mubr.bf16.gmra.mrb[20].mxu0 %v382_v61 }
  0xd0   : > { %568 = vmatprep.mubr.bf16.mxu0 %v1903_v0 }
  0xd7   : > { %569 = vmatmul.mubr.bf16.gmra.mrb[24].mxu0 %v383_v1 }
  0xd8   : > { %578 = vmatprep.mubr.bf16.mxu0 %v1903_v0  ;;  %v1692_v0 = vld [vmem:[#allocation8 + $0x8] sm:$0xff]  }
  0xd9   : > { %1456 = vmatpush3.bf16.msra.mxu0 %v1692_v0 }
  0xda   : > { %1457 = vmatprep.subr.bf16.mxu0 %v1693_v13 }
  0xdd   : > { %1458 = vmatpush3.bf16.msra.mxu0 %v2193_v14 }
  0xde   : > { %1459 = vmatprep.subr.bf16.mxu0 %v2195_v15 }
  0xdf   : > { %579 = vmatmul.mubr.bf16.gmra.mrb[28].mxu0 %v384_v4 }
  0xe1   : > { %1460 = vmatpush3.bf16.msra.mxu0 %v2198_v16 }
  0xe2   : > { %1461 = vmatprep.subr.bf16.mxu0 %v2201_v17 }
  0xe5   : > { %1462 = vmatpush3.bf16.msra.mxu0 %v2204_v18 }
  0xe6   : > { %1463 = vmatprep.subr.bf16.mxu0 %v2207_v19 }
 0x17a   : > { %v510_v27 = vpop.f32.mrb[0].mxu0 }
 0x17b   : > { %v511_v28 = vadd.f32 %v510_v27, %v2220_v25  ;;  %v512_v29 = vpop.f32.mrb[1].mxu0 }
 0x17c   : > { %v513_v30 = vadd.f32 %v512_v29, %v2224_v26  ;;  %v514_v31 = vpop.f32.mrb[2].mxu0 }
 0x17d   : > { %v515_v32 = vadd.f32 %v514_v31, %v2220_v25  ;;  %v516_v33 = vpop.f32.mrb[3].mxu0  ;;  %v589_v35 = vmax.f32 %v511_v28, 0.0 }
 0x17e   : > { %v517_v34 = vadd.f32 %v516_v33, %v2224_v26  ;;  %v590_v37 = vmax.f32 %v513_v30, 0.0 }
 0x17f   : > { %v591_v36 = vmax.f32 %v515_v32, 0.0 }
 0x180   : > { %v592_v38 = vmax.f32 %v517_v34, 0.0 }
 0x181   : > { %v621_v39 = vpack.c.bf16 %v591_v36, %v589_v35 }
 0x182   : > { %v520_v40 = vpop.f32.mrb[4].mxu0  ;;  %v622_v41 = vpack.c.bf16 %v592_v38, %v590_v37 }
 0x183   : > { %v521_v42 = vadd.f32 %v520_v40, %v2220_v25  ;;  %v522_v43 = vpop.f32.mrb[5].mxu0 }
 0x184   : > { %v523_v44 = vadd.f32 %v522_v43, %v2224_v26  ;;  %v524_v45 = vpop.f32.mrb[6].mxu0  ;;  %873 = vmatprep.mubr.bf16.mxu1 %v622_v41 }
 0x185   : > { %v525_v46 = vadd.f32 %v524_v45, %v2220_v25  ;;  %v526_v47 = vpop.f32.mrb[7].mxu0  ;;  %874 = vmatmul.mubr.bf16.vlgmr.msra.gmra.mrb[0].mxu1 %v621_v39  ;;  %v593_v49 = vmax.f32 %v521_v42, 0.0 }
 0x186   : > { %v527_v48 = vadd.f32 %v526_v47, %v2224_v26  ;;  %1525 = vmatpush3.bf16.msra.mxu1 %v1690_v11  ;;  %v594_v51 = vmax.f32 %v523_v44, 0.0 }
 0x187   : > { %v595_v50 = vmax.f32 %v525_v46, 0.0  ;;  %1518 = vmatprep.subr.bf16.mxu1 %v1691_v12 }
 0x188   : > { %v596_v52 = vmax.f32 %v527_v48, 0.0 }
 0x189   : > { %v623_v53 = vpack.c.bf16 %v595_v50, %v593_v49 }
 0x18a   : > { %v624_v54 = vpack.c.bf16 %v596_v52, %v594_v51  ;;  %v530_v55 = vpop.f32.mrb[8].mxu0  ;;  %1526 = vmatpush3.bf16.msra.mxu1 %v1692_v0 }
 0x18b   : > { %v531_v56 = vadd.f32 %v530_v55, %v2220_v25  ;;  %v532_v57 = vpop.f32.mrb[9].mxu0  ;;  %1519 = vmatprep.subr.bf16.mxu1 %v1693_v13 }
 0x18c   : > { %v533_v58 = vadd.f32 %v532_v57, %v2224_v26  ;;  %v534_v59 = vpop.f32.mrb[10].mxu0  ;;  %883 = vmatprep.mubr.bf16.mxu1 %v624_v54 }
 0x18d   : > { %v535_v60 = vadd.f32 %v534_v59, %v2220_v25  ;;  %v536_v61 = vpop.f32.mrb[11].mxu0  ;;  %884 = vmatmul.mubr.bf16.gmra.mrb[4].mxu1 %v623_v53  ;;  %v597_v63 = vmax.f32 %v531_v56, 0.0 }
 0x18e   : > { %v537_v62 = vadd.f32 %v536_v61, %v2224_v26  ;;  %1527 = vmatpush3.bf16.msra.mxu1 %v2193_v14  ;;  %v598_v2 = vmax.f32 %v533_v58, 0.0 }
 0x18f   : > { %v599_v1 = vmax.f32 %v535_v60, 0.0  ;;  %1520 = vmatprep.subr.bf16.mxu1 %v2195_v15 }
 0x190   : > { %v600_v3 = vmax.f32 %v537_v62, 0.0 }
 0x191   : > { %v625_v4 = vpack.c.bf16 %v599_v1, %v597_v63 }
 0x192   : > { %v626_v5 = vpack.c.bf16 %v600_v3, %v598_v2  ;;  %v540_v6 = vpop.f32.mrb[12].mxu0  ;;  %1528 = vmatpush3.bf16.msra.mxu1 %v2198_v16 }
 0x193   : > { %v541_v7 = vadd.f32 %v540_v6, %v2220_v25  ;;  %v542_v8 = vpop.f32.mrb[13].mxu0  ;;  %1521 = vmatprep.subr.bf16.mxu1 %v2201_v17 }
 0x194   : > { %v543_v9 = vadd.f32 %v542_v8, %v2224_v26  ;;  %v544_v10 = vpop.f32.mrb[14].mxu0  ;;  %893 = vmatprep.mubr.bf16.mxu1 %v626_v5 }
 0x195   : > { %v545_v11 = vadd.f32 %v544_v10, %v2220_v25  ;;  %v546_v12 = vpop.f32.mrb[15].mxu0  ;;  %894 = vmatmul.mubr.bf16.gmra.mrb[8].mxu1 %v625_v4  ;;  %v601_v13 = vmax.f32 %v541_v7, 0.0 }
 0x196   : > { %v547_v0 = vadd.f32 %v546_v12, %v2224_v26  ;;  %1529 = vmatpush3.bf16.msra.mxu1 %v2204_v18  ;;  %v602_v15 = vmax.f32 %v543_v9, 0.0 }
 0x197   : > { %v603_v14 = vmax.f32 %v545_v11, 0.0  ;;  %1522 = vmatprep.subr.bf16.mxu1 %v2207_v19 }
 0x198   : > { %v604_v16 = vmax.f32 %v547_v0, 0.0 }
 0x199   : > { %v627_v20 = vpack.c.bf16 %v603_v14, %v601_v13 }
 0x19a   : > { %v628_v17 = vpack.c.bf16 %v604_v16, %v602_v15  ;;  %v550_v23 = vpop.f32.mrb[16].mxu0  ;;  %v1700_v16 = vld [vmem:[#allocation8 + $0x28] sm:$0xff]  }
 0x19b   : > { %v551_v27 = vadd.f32 %v550_v23, %v2220_v25  ;;  %v552_v28 = vpop.f32.mrb[17].mxu0  ;;  %1464 = vmatpush3.bf16.msra.mxu0 %v1700_v16  ;;  %1530 = vmatpush3.bf16.msra.mxu1 %v1700_v16  ;;  %v1704_v23 = vld [vmem:[#allocation8 + $0x38] sm:$0xff]  }
 0x19c   : > { %v553_v29 = vadd.f32 %v552_v28, %v2224_v26  ;;  %v554_v30 = vpop.f32.mrb[18].mxu0  ;;  %903 = vmatprep.mubr.bf16.mxu1 %v628_v17  ;;  %v1702_v17 = vld [vmem:[#allocation8 + $0x30] sm:$0xff]  }
 0x19d   : > { %v555_v31 = vadd.f32 %v554_v30, %v2220_v25  ;;  %v556_v32 = vpop.f32.mrb[19].mxu0  ;;  %904 = vmatmul.mubr.bf16.gmra.mrb[12].mxu1 %v627_v20  ;;  %v605_v33 = vmax.f32 %v551_v27, 0.0  ;;  %v1701_v20 = vld [vmem:[#allocation8 + $0x70] sm:$0xff]  }
 0x19e   : > { %v557_v18 = vadd.f32 %v556_v32, %v2224_v26  ;;  %v606_v34 = vmax.f32 %v553_v29, 0.0  ;;  %1465 = vmatprep.subr.bf16.mxu0 %v1701_v20  ;;  %1523 = vmatprep.subr.bf16.mxu1 %v1701_v20 }
 0x19f   : > { %v607_v19 = vmax.f32 %v555_v31, 0.0  ;;  %1466 = vmatpush3.bf16.msra.mxu0 %v1702_v17  ;;  %1531 = vmatpush3.bf16.msra.mxu1 %v1702_v17 }
 0x1a0   : > { %v608_v35 = vmax.f32 %v557_v18, 0.0 }
 0x1a1   : > { %v629_v36 = vpack.c.bf16 %v607_v19, %v605_v33 }
 0x1a2   : > { %v630_v37 = vpack.c.bf16 %v608_v35, %v606_v34  ;;  %v560_v38 = vpop.f32.mrb[20].mxu0 }
 0x1a3   : > { %v561_v39 = vadd.f32 %v560_v38, %v2220_v25  ;;  %v562_v40 = vpop.f32.mrb[21].mxu0 }
 0x1a4   : > { %v563_v41 = vadd.f32 %v562_v40, %v2224_v26  ;;  %v564_v42 = vpop.f32.mrb[22].mxu0  ;;  %913 = vmatprep.mubr.bf16.mxu1 %v630_v37 }
 0x1a5   : > { %v565_v43 = vadd.f32 %v564_v42, %v2220_v25  ;;  %v566_v44 = vpop.f32.mrb[23].mxu0  ;;  %914 = vmatmul.mubr.bf16.gmra.mrb[16].mxu1 %v629_v36  ;;  %v609_v46 = vmax.f32 %v561_v39, 0.0 }
 0x1a6   : > { %v567_v45 = vadd.f32 %v566_v44, %v2224_v26  ;;  %v610_v48 = vmax.f32 %v563_v41, 0.0 }
 0x1a7   : > { %v611_v47 = vmax.f32 %v565_v43, 0.0 }
 0x1a8   : > { %v612_v49 = vmax.f32 %v567_v45, 0.0 }
 0x1a9   : > { %v631_v50 = vpack.c.bf16 %v611_v47, %v609_v46 }
 0x1aa   : > { %v632_v51 = vpack.c.bf16 %v612_v49, %v610_v48  ;;  %v570_v52 = vpop.f32.mrb[24].mxu0 }
 0x1ab   : > { %v571_v53 = vadd.f32 %v570_v52, %v2220_v25  ;;  %v572_v54 = vpop.f32.mrb[25].mxu0 }
 0x1ac   : > { %v573_v55 = vadd.f32 %v572_v54, %v2224_v26  ;;  %v574_v56 = vpop.f32.mrb[26].mxu0  ;;  %923 = vmatprep.mubr.bf16.mxu1 %v632_v51 }
 0x1ad   : > { %v575_v57 = vadd.f32 %v574_v56, %v2220_v25  ;;  %v576_v58 = vpop.f32.mrb[27].mxu0  ;;  %924 = vmatmul.mubr.bf16.gmra.mrb[20].mxu1 %v631_v50  ;;  %v613_v60 = vmax.f32 %v571_v53, 0.0 }
 0x1ae   : > { %v577_v59 = vadd.f32 %v576_v58, %v2224_v26  ;;  %v614_v62 = vmax.f32 %v573_v55, 0.0 }
 0x1af   : > { %v615_v61 = vmax.f32 %v575_v57, 0.0 }
 0x1b0   : > { %v616_v63 = vmax.f32 %v577_v59, 0.0 }
 0x1b1   : > { %v633_v1 = vpack.c.bf16 %v615_v61, %v613_v60 }
 0x1b2   : > { %v634_v2 = vpack.c.bf16 %v616_v63, %v614_v62  ;;  %v580_v3 = vpop.f32.mrb[28].mxu0 }
 0x1b3   : > { %v581_v4 = vadd.f32 %v580_v3, %v2220_v25  ;;  %v582_v5 = vpop.f32.mrb[29].mxu0 }
 0x1b4   : > { %v583_v6 = vadd.f32 %v582_v5, %v2224_v26  ;;  %v584_v7 = vpop.f32.mrb[30].mxu0  ;;  %933 = vmatprep.mubr.bf16.mxu1 %v634_v2 }
 0x1b5   : > { %v585_v8 = vadd.f32 %v584_v7, %v2220_v25  ;;  %v586_v9 = vpop.f32.mrb[31].mxu0  ;;  %934 = vmatmul.mubr.bf16.gmra.mrb[24].mxu1 %v633_v1  ;;  %v617_v11 = vmax.f32 %v581_v4, 0.0  ;;  %v1703_v25 = vld [vmem:[#allocation8 + $0x78] sm:$0xff]  }
 0x1b6   : > { %v587_v10 = vadd.f32 %v586_v9, %v2224_v26  ;;  %v618_v0 = vmax.f32 %v583_v6, 0.0  ;;  %1467 = vmatprep.subr.bf16.mxu0 %v1703_v25  ;;  %1524 = vmatprep.subr.bf16.mxu1 %v1703_v25  ;;  %v669_v26 = vld [vmem:[%s2403_s4] sm:$0x3] }
 0x1b7   : > { %v619_v12 = vmax.f32 %v585_v8, 0.0  ;;  %1468 = vmatpush3.bf16.msra.mxu0 %v1704_v23  ;;  %1532 = vmatpush3.bf16.msra.mxu1 %v1704_v23  ;;  %v2269_v27 = vrot.slane %v669_v26, %v388_v22  ;;  %v2273_v28 = vrot.slane %v669_v26, %v392_v24 }
 0x1b8   : > { %v620_v13 = vmax.f32 %v587_v10, 0.0 }
 0x1b9   : > { %v635_v14 = vpack.c.bf16 %v619_v12, %v617_v11 }
 0x1ba   : > { %v636_v15 = vpack.c.bf16 %v620_v13, %v618_v0 }
 0x1bc   : > { %943 = vmatprep.mubr.bf16.mxu1 %v636_v15 }
 0x1bd   : > { %944 = vmatmul.mubr.bf16.gmra.mrb[28].mxu1 %v635_v14 }
 0x258   : > { %v875_v29 = vpop.f32.mrb[0].mxu1 }
 0x259   : > { %v876_v30 = vadd.f32 %v875_v29, %v2269_v27  ;;  %v877_v31 = vpop.f32.mrb[1].mxu1 }
 0x25a   : > { %v878_v32 = vadd.f32 %v877_v31, %v2273_v28  ;;  %v879_v18 = vpop.f32.mrb[2].mxu1 }
 0x25b   : > { %v880_v33 = vadd.f32 %v879_v18, %v2269_v27  ;;  %v881_v19 = vpop.f32.mrb[3].mxu1  ;;  %v954_v35 = vmax.f32 %v876_v30, 0.0 }
 0x25c   : > { %v882_v34 = vadd.f32 %v881_v19, %v2273_v28  ;;  %v955_v22 = vmax.f32 %v878_v32, 0.0 }
 0x25d   : > { %v956_v36 = vmax.f32 %v880_v33, 0.0 }
 0x25e   : > { %v957_v37 = vmax.f32 %v882_v34, 0.0 }
 0x25f   : > { %v986_v38 = vpack.c.bf16 %v956_v36, %v954_v35 }
 0x260   : > { %v987_v21 = vpack.c.bf16 %v957_v37, %v955_v22  ;;  %v885_v24 = vpop.f32.mrb[4].mxu1 }
 0x261   : > { %v886_v39 = vadd.f32 %v885_v24, %v2269_v27  ;;  %v887_v40 = vpop.f32.mrb[5].mxu1 }
 0x262   : > { %v888_v41 = vadd.f32 %v887_v40, %v2273_v28  ;;  %v889_v42 = vpop.f32.mrb[6].mxu1  ;;  %1169 = vmatprep.mubr.bf16.mxu0 %v987_v21 }
 0x263   : > { %v890_v43 = vadd.f32 %v889_v42, %v2269_v27  ;;  %v891_v44 = vpop.f32.mrb[7].mxu1  ;;  %1170 = vmatmul.mubr.bf16.vlgmr.msra.gmra.mrb[32].mxu0 %v986_v38  ;;  %v958_v46 = vmax.f32 %v886_v39, 0.0 }
 0x264   : > { %v892_v45 = vadd.f32 %v891_v44, %v2273_v28  ;;  %v959_v48 = vmax.f32 %v888_v41, 0.0 }
 0x265   : > { %v960_v47 = vmax.f32 %v890_v43, 0.0 }
 0x266   : > { %v961_v49 = vmax.f32 %v892_v45, 0.0 }
 0x267   : > { %v988_v50 = vpack.c.bf16 %v960_v47, %v958_v46 }
 0x268   : > { %v989_v51 = vpack.c.bf16 %v961_v49, %v959_v48  ;;  %v895_v52 = vpop.f32.mrb[8].mxu1 }
 0x269   : > { %v896_v53 = vadd.f32 %v895_v52, %v2269_v27  ;;  %v897_v54 = vpop.f32.mrb[9].mxu1 }
 0x26a   : > { %v898_v55 = vadd.f32 %v897_v54, %v2273_v28  ;;  %v899_v56 = vpop.f32.mrb[10].mxu1  ;;  %1177 = vmatprep.mubr.bf16.mxu0 %v989_v51 }
 0x26b   : > { %v900_v57 = vadd.f32 %v899_v56, %v2269_v27  ;;  %v901_v58 = vpop.f32.mrb[11].mxu1  ;;  %1178 = vmatmul.mubr.bf16.gmra.mrb[36].mxu0 %v988_v50  ;;  %v962_v60 = vmax.f32 %v896_v53, 0.0 }
 0x26c   : > { %v902_v59 = vadd.f32 %v901_v58, %v2273_v28  ;;  %v963_v62 = vmax.f32 %v898_v55, 0.0 }
 0x26d   : > { %v964_v61 = vmax.f32 %v900_v57, 0.0 }
 0x26e   : > { %v965_v63 = vmax.f32 %v902_v59, 0.0 }
 0x26f   : > { %v990_v1 = vpack.c.bf16 %v964_v61, %v962_v60 }
 0x270   : > { %v991_v2 = vpack.c.bf16 %v965_v63, %v963_v62  ;;  %v905_v3 = vpop.f32.mrb[12].mxu1 }
 0x271   : > { %v906_v4 = vadd.f32 %v905_v3, %v2269_v27  ;;  %v907_v5 = vpop.f32.mrb[13].mxu1 }
 0x272   : > { %v908_v6 = vadd.f32 %v907_v5, %v2273_v28  ;;  %v909_v7 = vpop.f32.mrb[14].mxu1  ;;  %1185 = vmatprep.mubr.bf16.mxu0 %v991_v2 }
 0x273   : > { %v910_v8 = vadd.f32 %v909_v7, %v2269_v27  ;;  %v911_v9 = vpop.f32.mrb[15].mxu1  ;;  %1186 = vmatmul.mubr.bf16.gmra.mrb[40].mxu0 %v990_v1  ;;  %v966_v11 = vmax.f32 %v906_v4, 0.0 }
 0x274   : > { %v912_v10 = vadd.f32 %v911_v9, %v2273_v28  ;;  %v967_v0 = vmax.f32 %v908_v6, 0.0 }
 0x275   : > { %v968_v12 = vmax.f32 %v910_v8, 0.0 }
 0x276   : > { %v969_v13 = vmax.f32 %v912_v10, 0.0 }
 0x277   : > { %v992_v14 = vpack.c.bf16 %v968_v12, %v966_v11  ;;  %v2310_v12 = vld [vmem:[%s2405_s6] ss:$0 sm:$0xff] }
 0x278   : > { %v993_v15 = vpack.c.bf16 %v969_v13, %v967_v0  ;;  %v915_v16 = vpop.f32.mrb[16].mxu1 }
 0x279   : > { %v916_v20 = vadd.f32 %v915_v16, %v2269_v27  ;;  %v917_v17 = vpop.f32.mrb[17].mxu1 }
 0x27a   : > { %v918_v25 = vadd.f32 %v917_v17, %v2273_v28  ;;  %v919_v23 = vpop.f32.mrb[18].mxu1  ;;  %1193 = vmatprep.mubr.bf16.mxu0 %v993_v15 }
 0x27b   : > { %v920_v26 = vadd.f32 %v919_v23, %v2269_v27  ;;  %v921_v29 = vpop.f32.mrb[19].mxu1  ;;  %1194 = vmatmul.mubr.bf16.gmra.mrb[44].mxu0 %v992_v14  ;;  %v970_v31 = vmax.f32 %v916_v20, 0.0 }
 0x27c   : > { %v922_v30 = vadd.f32 %v921_v29, %v2273_v28  ;;  %v971_v18 = vmax.f32 %v918_v25, 0.0 }
 0x27d   : > { %v972_v32 = vmax.f32 %v920_v26, 0.0 }
 0x27e   : > { %v973_v33 = vmax.f32 %v922_v30, 0.0 }
 0x27f   : > { %v994_v19 = vpack.c.bf16 %v972_v32, %v970_v31 }
 0x280   : > { %v995_v34 = vpack.c.bf16 %v973_v33, %v971_v18  ;;  %v925_v35 = vpop.f32.mrb[20].mxu1 }
 0x281   : > { %v926_v36 = vadd.f32 %v925_v35, %v2269_v27  ;;  %v927_v22 = vpop.f32.mrb[21].mxu1 }
 0x282   : > { %v928_v37 = vadd.f32 %v927_v22, %v2273_v28  ;;  %v929_v38 = vpop.f32.mrb[22].mxu1  ;;  %1201 = vmatprep.mubr.bf16.mxu0 %v995_v34 }
 0x283   : > { %v930_v21 = vadd.f32 %v929_v38, %v2269_v27  ;;  %v931_v24 = vpop.f32.mrb[23].mxu1  ;;  %1202 = vmatmul.mubr.bf16.gmra.mrb[48].mxu0 %v994_v19  ;;  %v974_v40 = vmax.f32 %v926_v36, 0.0 }
 0x284   : > { %v932_v39 = vadd.f32 %v931_v24, %v2273_v28  ;;  %v975_v42 = vmax.f32 %v928_v37, 0.0 }
 0x285   : > { %v976_v41 = vmax.f32 %v930_v21, 0.0 }
 0x286   : > { %v977_v43 = vmax.f32 %v932_v39, 0.0 }
 0x287   : > { %v996_v44 = vpack.c.bf16 %v976_v41, %v974_v40 }
 0x288   : > { %v997_v45 = vpack.c.bf16 %v977_v43, %v975_v42  ;;  %v935_v46 = vpop.f32.mrb[24].mxu1 }
 0x289   : > { %v936_v47 = vadd.f32 %v935_v46, %v2269_v27  ;;  %v937_v48 = vpop.f32.mrb[25].mxu1 }
 0x28a   : > { %v938_v49 = vadd.f32 %v937_v48, %v2273_v28  ;;  %v939_v50 = vpop.f32.mrb[26].mxu1  ;;  %1209 = vmatprep.mubr.bf16.mxu0 %v997_v45 }
 0x28b   : > { %v940_v51 = vadd.f32 %v939_v50, %v2269_v27  ;;  %v941_v52 = vpop.f32.mrb[27].mxu1  ;;  %1210 = vmatmul.mubr.bf16.gmra.mrb[52].mxu0 %v996_v44  ;;  %v978_v54 = vmax.f32 %v936_v47, 0.0 }
 0x28c   : > { %v942_v53 = vadd.f32 %v941_v52, %v2273_v28  ;;  %v979_v56 = vmax.f32 %v938_v49, 0.0 }
 0x28d   : > { %v980_v55 = vmax.f32 %v940_v51, 0.0 }
 0x28e   : > { %v981_v57 = vmax.f32 %v942_v53, 0.0 }
 0x28f   : > { %v998_v58 = vpack.c.bf16 %v980_v55, %v978_v54 }
 0x290   : > { %v999_v59 = vpack.c.bf16 %v981_v57, %v979_v56  ;;  %v945_v60 = vpop.f32.mrb[28].mxu1 }
 0x291   : > { %v946_v61 = vadd.f32 %v945_v60, %v2269_v27  ;;  %v947_v62 = vpop.f32.mrb[29].mxu1 }
 0x292   : > { %v948_v63 = vadd.f32 %v947_v62, %v2273_v28  ;;  %v949_v1 = vpop.f32.mrb[30].mxu1  ;;  %1217 = vmatprep.mubr.bf16.mxu1 %v999_v59 }
 0x293   : > { %v950_v2 = vadd.f32 %v949_v1, %v2269_v27  ;;  %v951_v3 = vpop.f32.mrb[31].mxu1  ;;  %1218 = vmatmul.mubr.bf16.vlgmr.msra.gmra.mrb[32].mxu1 %v998_v58  ;;  %v982_v5 = vmax.f32 %v946_v61, 0.0 }
 0x294   : > { %v952_v4 = vadd.f32 %v951_v3, %v2273_v28  ;;  %v983_v7 = vmax.f32 %v948_v63, 0.0 }
 0x295   : > { %v984_v6 = vmax.f32 %v950_v2, 0.0 }
 0x296   : > { %v985_v8 = vmax.f32 %v952_v4, 0.0 }
 0x297   : > { %v1000_v9 = vpack.c.bf16 %v984_v6, %v982_v5 }
 0x298   : > { %v1001_v10 = vpack.c.bf16 %v985_v8, %v983_v7 }
 0x29a   : > { %1225 = vmatprep.mubr.bf16.mxu1 %v1001_v10 }
 0x29b   : > { %1226 = vmatmul.mubr.bf16.gmra.mrb[36].mxu1 %v1000_v9 }
 0x336   : > { %v1469_v11 = vpop.f32.mrb[32].mxu0 }
 0x337   : > { %v1470_v27 = vpop.f32.mrb[33].mxu0 }
 0x338   : > { %v1471_v0 = vadd.f32 %v1470_v27, %v1469_v11  ;;  %v1472_v13 = vpop.f32.mrb[34].mxu0 }
 0x339   : > { %v1473_v14 = vpop.f32.mrb[35].mxu0 }
 0x33a   : > { %v1172_v28 = vadd.f32 %v1471_v0, %v2310_v12  ;;  %v1474_v15 = vadd.f32 %v1473_v14, %v1472_v13 }
 0x33c   : > { %1234 = vst [vmem:[%s2315_s19] sm:$0xff] %v1172_v28  ;;  %v1175_v16 = vadd.f32 %v1474_v15, %v2310_v12 }
 0x33e   : > { %1235 = vst [vmem:[%s2315_s19 + $0x8] sm:$0xff] %v1175_v16  ;;  %v1475_v20 = vpop.f32.mrb[36].mxu0 }
 0x33f   : > { %v1476_v17 = vpop.f32.mrb[37].mxu0 }
 0x340   : > { %v1477_v25 = vadd.f32 %v1476_v17, %v1475_v20  ;;  %v1478_v23 = vpop.f32.mrb[38].mxu0 }
 0x341   : > { %v1479_v26 = vpop.f32.mrb[39].mxu0 }
 0x342   : > { %v1180_v29 = vadd.f32 %v1477_v25, %v2310_v12  ;;  %v1480_v30 = vadd.f32 %v1479_v26, %v1478_v23 }
 0x344   : > { %1236 = vst [vmem:[%s2315_s19 + $0x10] sm:$0xff] %v1180_v29  ;;  %v1183_v31 = vadd.f32 %v1480_v30, %v2310_v12 }
 0x346   : > { %1237 = vst [vmem:[%s2315_s19 + $0x18] sm:$0xff] %v1183_v31  ;;  %v1481_v32 = vpop.f32.mrb[40].mxu0 }
 0x347   : > { %v1482_v18 = vpop.f32.mrb[41].mxu0 }
 0x348   : > { %v1483_v33 = vadd.f32 %v1482_v18, %v1481_v32  ;;  %v1484_v19 = vpop.f32.mrb[42].mxu0 }
 0x349   : > { %v1485_v34 = vpop.f32.mrb[43].mxu0 }
 0x34a   : > { %v1188_v35 = vadd.f32 %v1483_v33, %v2310_v12  ;;  %v1486_v36 = vadd.f32 %v1485_v34, %v1484_v19 }
 0x34c   : > { %1238 = vst [vmem:[%s2315_s19 + $0x20] sm:$0xff] %v1188_v35  ;;  %v1191_v22 = vadd.f32 %v1486_v36, %v2310_v12 }
 0x34e   : > { %1239 = vst [vmem:[%s2315_s19 + $0x28] sm:$0xff] %v1191_v22  ;;  %v1487_v37 = vpop.f32.mrb[44].mxu0 }
 0x34f   : > { %v1488_v38 = vpop.f32.mrb[45].mxu0 }
 0x350   : > { %v1489_v21 = vadd.f32 %v1488_v38, %v1487_v37  ;;  %v1490_v24 = vpop.f32.mrb[46].mxu0 }
 0x351   : > { %v1491_v39 = vpop.f32.mrb[47].mxu0 }
 0x352   : > { %v1196_v40 = vadd.f32 %v1489_v21, %v2310_v12  ;;  %v1492_v41 = vadd.f32 %v1491_v39, %v1490_v24 }
 0x354   : > { %1240 = vst [vmem:[%s2315_s19 + $0x30] sm:$0xff] %v1196_v40  ;;  %v1199_v42 = vadd.f32 %v1492_v41, %v2310_v12 }
 0x356   : > { %1241 = vst [vmem:[%s2315_s19 + $0x38] sm:$0xff] %v1199_v42  ;;  %v1493_v43 = vpop.f32.mrb[48].mxu0 }
 0x357   : > { %v1494_v44 = vpop.f32.mrb[49].mxu0 }
 0x358   : > { %v1495_v45 = vadd.f32 %v1494_v44, %v1493_v43  ;;  %v1496_v46 = vpop.f32.mrb[50].mxu0 }
 0x359   : > { %v1497_v47 = vpop.f32.mrb[51].mxu0 }
 0x35a   : > { %v1204_v48 = vadd.f32 %v1495_v45, %v2310_v12  ;;  %v1498_v49 = vadd.f32 %v1497_v47, %v1496_v46 }
 0x35c   : > { %1242 = vst [vmem:[%s2315_s19 + $0x40] sm:$0xff] %v1204_v48  ;;  %v1207_v50 = vadd.f32 %v1498_v49, %v2310_v12 }
 0x35e   : > { %1243 = vst [vmem:[%s2315_s19 + $0x48] sm:$0xff] %v1207_v50  ;;  %v1499_v51 = vpop.f32.mrb[52].mxu0 }
 0x35f   : > { %v1500_v52 = vpop.f32.mrb[53].mxu0 }
 0x360   : > { %v1501_v53 = vadd.f32 %v1500_v52, %v1499_v51  ;;  %v1502_v54 = vpop.f32.mrb[54].mxu0 }
 0x361   : > { %v1503_v55 = vpop.f32.mrb[55].mxu0 }
 0x362   : > { %v1212_v56 = vadd.f32 %v1501_v53, %v2310_v12  ;;  %v1504_v57 = vadd.f32 %v1503_v55, %v1502_v54 }
 0x364   : > { %1244 = vst [vmem:[%s2315_s19 + $0x50] sm:$0xff] %v1212_v56  ;;  %v1215_v58 = vadd.f32 %v1504_v57, %v2310_v12 }
 0x366   : > { %1245 = vst [vmem:[%s2315_s19 + $0x58] sm:$0xff] %v1215_v58  ;;  %v1505_v59 = vpop.f32.mrb[32].mxu1 }
 0x367   : > { %v1506_v60 = vpop.f32.mrb[33].mxu1 }
 0x368   : > { %v1507_v61 = vadd.f32 %v1506_v60, %v1505_v59  ;;  %v1508_v62 = vpop.f32.mrb[34].mxu1 }
 0x369   : > { %v1509_v63 = vpop.f32.mrb[35].mxu1 }
 0x36a   : > { %v1220_v1 = vadd.f32 %v1507_v61, %v2310_v12  ;;  %v1510_v2 = vadd.f32 %v1509_v63, %v1508_v62 }
 0x36c   : > { %1246 = vst [vmem:[%s2315_s19 + $0x60] sm:$0xff] %v1220_v1  ;;  %v1223_v3 = vadd.f32 %v1510_v2, %v2310_v12 }
 0x36e   : > { %1247 = vst [vmem:[%s2315_s19 + $0x68] sm:$0xff] %v1223_v3  ;;  %v1511_v4 = vpop.f32.mrb[36].mxu1 }
 0x36f   : > { %v1512_v5 = vpop.f32.mrb[37].mxu1 }
 0x370   : > { %v1513_v6 = vadd.f32 %v1512_v5, %v1511_v4  ;;  %v1514_v7 = vpop.f32.mrb[38].mxu1 }
 0x371   : > { %v1515_v8 = vpop.f32.mrb[39].mxu1 }
 0x372   : > { %v1228_v9 = vadd.f32 %v1513_v6, %v2310_v12  ;;  %v1516_v10 = vadd.f32 %v1515_v8, %v1514_v7 }
 0x374   : > { %1248 = vst [vmem:[%s2315_s19 + $0x70] sm:$0xff] %v1228_v9  ;;  %v1231_v11 = vadd.f32 %v1516_v10, %v2310_v12 }
 0x376   : > { %1249 = vst [vmem:[%s2315_s19 + $0x78] sm:$0xff] %v1231_v11 }
 0x377   : > { %1832 = shalt.err (!%p1829_p4)
}
 0x378   : > { %s1833_s13 = scalar_lea.hbm %s2350_s10, 2048  ;;  %s1837_s8 = scalar_lea.hbm %s2406_s7, 4096 }
 0x379   : > { %p1834_p9 = scmp.ne.s32.totalorder %s2350_s10, %s1833_s13  ;;  %p1838_p8 = scmp.lt.u32.totalorder %s2350_s10, %s2406_s7 }
 0x37a   : > { %p1839_p13 = scmp.lt.u32.totalorder %s1837_s8, %s1833_s13  ;;  %p1841_p10 = scmp.lt.u32.totalorder %s1833_s13, %s2350_s10 }
 0x37b   : > { %p1835_p0 = pnand %p1834_p9, %p2098_p5 }
 0x37c   : > { %p1840_p6 = por %p1839_p13, %p1838_p8 }
 0x37d   : > { %p1836_p11 = pneg %p1835_p0 }
 0x37e   : > { %p1842_p3 = por %p1841_p10, %p1840_p6 }
 0x380   : > { %p1843_p7 = pnand %p1842_p3, %p1836_p11 }
 0x382   : > { %1846 = shalt.err (!%p1843_p7)
}
 0x383   : > { %s1905_s16 = smov 128   ;;  %s1906_s11 = smov 8  }
 0x384   : > { %1547 = dma.vmem_to_hbm [thread:$0]  (%p2098_p5), %s2352_s29, 2048, %s2350_s10, %s1251_s28, %s1905_s16, %s1905_s16, %s1906_s11  }
 0x385 PF: > { %s2426_s22 = sld [smem:[#allocation15_spill]]  ;;  %s1279_s17 = sand.u32 1, %s1881_s24  }
 0x386   : > { %p2428_p1 = scmp.ge.s32.totalorder %s1893_s27, 2  ;;  %s1280_s30 = scalar_lea.sflag [#allocation4], %s1279_s17 }
 0x38b   : > { %p2427_p12 = scmp.ne.s32.totalorder %s2426_s22, 0 }
 0x38d   : > { %p1564_p2 = pnand %p2428_p1, %p2427_p12 }
 0x38f   : > { %1876 = dma.done.wait (!%p1564_p2), %s1280_s30, 2048  }
 0x390   : > { %1878 = vsyncadd (!%p1564_p2), %s1280_s30, 4294965248  ;;  %p22_p4 = scmp.ge.s32.totalorder %s2084_s18, 4   ;;  %s2429_s24 = smov %s1885_s25 }
 0x391   : > { %s2430_s25 = smov %s1889_s26  ;;  %s2431_s26 = smov %s2094_s21 }
 0x392   : > { %s2432_s27 = smov %s2084_s18  ;;  %24 = sbr.rel (!%p22_p4) target bundleno = 7 (0x7), region = 105 }
 0x399   :  { %1285 = vsyncpa [#allocation3], 1 }
 0x39a   :  { %1287 = vsyncpa [#allocation3 + $0x1], 1 }
 0x39b   :  { %1288 = vsyncpa [#allocation6], 1 }
 0x39c   :  { %1289 = vsyncpa [#allocation9], 1 }
 0x39d   :  { %1290 = vsyncpa [#allocation4], 1 }
 0x39e   :  { %1292 = vsyncpa [#allocation4 + $0x1], 1 }

// kernel: tpu_custom_call.1
= control target key start
LH: loop header
LB: loop body
LE: loop exit
PB: predicated region body
PF: predicated region fallthrough
CT: control target
= control target key end

     0   :  { %12 = vsyncpa [#allocation3], 0  ;;  %s2399_s0 = inlined_call_operand.hbm [shape: f32[256,128], index: 0, kind: input, shape index: {}]   ;;  %s2400_s1 = inlined_call_operand.hbm [shape: bf16[128,256], index: 1, kind: input, shape index: {}]   ;;  %s2401_s2 = inlined_call_operand.vmem [shape: f32[1,256], index: 2, kind: input, shape index: {}]   ;;  %s2402_s3 = inlined_call_operand.hbm [shape: bf16[256,256], index: 3, kind: input, shape index: {}]   ;;  %s2403_s4 = inlined_call_operand.vmem [shape: f32[1,256], index: 4, kind: input, shape index: {}]   ;;  %s2404_s5 = inlined_call_operand.hbm [shape: bf16[256,128], index: 5, kind: input, shape index: {}]   ;;  %s2405_s6 = inlined_call_operand.vmem [shape: f32[1,128], index: 6, kind: input, shape index: {}]   ;;  %s2406_s7 = inlined_call_operand.hbm [shape: f32[256,128], index: 7, kind: output, shape index: {}]  }
   0x1   :  { %14 = vsyncpa [#allocation3 + $0x1], 0 }
   0x2   :  { %15 = vsyncpa [#allocation6], 0 }
   0x3   :  { %16 = vsyncpa [#allocation9], 0 }
   0x4   :  { %17 = vsyncpa [#allocation4], 0 }
   0x5   :  { %19 = vsyncpa [#allocation4 + $0x1], 0  ;;  %s1947_s24 = smov 0   ;;  %s1949_s25 = smov 0  }
   0x6   :  { %s1951_s26 = smov 0   ;;  %s1953_s27 = smov 0  }
   0x7 LB: > { %s1968_s28 = sadd.s32 4294967295, %s1893_s27   ;;  %s1366_s29 = sadd.s32 4294967294, %s1893_s27   ;;  %s1893_s27 = sphi %s1953_s27, %s2432_s27   ;;  %s1889_s26 = sphi %s1951_s26, %s2431_s26   ;;  %s1885_s25 = sphi %s1949_s25, %s2430_s25   ;;  %s1881_s24 = sphi %s1947_s24, %s2429_s24  }
   0x8   : > { %p45_p0 = scmp.ne.s32.totalorder %s1885_s25, %s1881_s24  ;;  %p2407_p1 = scmp.eq.s32.totalorder %s1968_s28, 0 }
   0x9   : > { %p201_p3 = scmp.eq.s32.totalorder %s1366_s29, 1  ;;  %p1367_p5 = scmp.ge.s32.totalorder %s1893_s27, 1 }
   0xa   : > { %p1977_p4 = por %p2407_p1, %p45_p0  ;;  %p208_p7 = scmp.lt.s32.totalorder %s1893_s27, 3 }
   0xb   : > { %p1982_p6 = por %p201_p3, %p45_p0  ;;  %s1895_s10 = smov [#allocation5]  }
   0xc   : > { %s2411_s30 = scalar_select %p1977_p4, 1, 0 }
   0xd   : > { %s2412_s8 = scalar_select %p1982_p6, 1, 0 }
   0xe   : > { %p1987_p8 = pnand %p1367_p5, %p208_p7  ;;  %s220_s11 = sshll.u32 %s1895_s10, 4  ;;  %s1991_s11 = int_to_ptr.vmem [resolvable:$true] %s220_s11 }
   0xf   : > { %2413 = sst [smem:[#allocation15_spill]] %s2412_s8  ;;  %s1896_s13 = smov [#allocation7]  }
  0x10   : > { %s2414_s9 = scalar_select %p1987_p8, 1, 0 }
  0x11   : > { %p1549_p9 = pneg %p1987_p8  ;;  %s236_s14 = sshll.u32 %s1896_s13, 4  ;;  %s2002_s14 = int_to_ptr.vmem [resolvable:$true] %s236_s14 }
  0x12   : > { %s1897_s15 = smov [#allocation8]   ;;  %s1705_s19 = scalar_lea.hbm %s2400_s1, 2048 }
  0x13   : > { %p1998_p11 = pnand %p1549_p9, %p2407_p1  ;;  %s2004_s16 = sshll.u32 %s1897_s15, 4  ;;  %s253_s16 = int_to_ptr.vmem [resolvable:$true] %s2004_s16 }
  0x14   : > { %p1706_p12 = scmp.ne.s32.totalorder %s2400_s1, %s1705_s19  ;;  %p1712_p5 = scmp.lt.u32.totalorder %s1705_s19, %s2400_s1 }
  0x15   : > { %p2014_p13 = pneg %p1998_p11 }
  0x17   : > { %p1708_p0 = pnand %p2014_p13, %p1706_p12 }
  0x19   : > { %p1709_p3 = pneg %p1708_p0 }
  0x1b   : > { %p1714_p7 = pnand %p1712_p5, %p1709_p3 }
  0x1d   : > { %1717 = shalt.err (!%p1714_p7)
}
  0x1e   : > { %s1718_s10 = scalar_lea.vmem %s1991_s11, 2048  ;;  %p1726_p2 = scmp.lt.s32.totalorder %s1991_s11, %s1991_s11 }
  0x1f   : > { %p1719_p9 = scmp.ne.s32.totalorder %s1991_s11, %s1718_s10  ;;  %p1727_p6 = scmp.lt.s32.totalorder %s1718_s10, %s1718_s10 }
  0x21   : > { %p1721_p10 = pnand %p1719_p9, %p2014_p13  ;;  %p1728_p12 = por %p1727_p6, %p1726_p2 }
  0x23   : > { %p1722_p1 = pneg %p1721_p10 }
  0x25   : > { %p1729_p0 = pnand %p1728_p12, %p1722_p1 }
  0x27   : > { %1732 = shalt.err (!%p1729_p0)
}
  0x28   : > { %s1898_s13 = smov 128   ;;  %s1899_s15 = smov 8  }
  0x29   : > { %1552 = dma.hbm_to_vmem [thread:$0]  (!%p1998_p11), %s2400_s1, 2048, %s1991_s11, [#allocation6], %s1898_s13, %s1898_s13, %s1899_s15  }
  0x2a   : > { %s1733_s21 = scalar_lea.hbm %s2402_s3, 4096 }
  0x2b   : > { %p1734_p1 = scmp.ne.s32.totalorder %s2402_s3, %s1733_s21  ;;  %p1740_p10 = scmp.lt.u32.totalorder %s1733_s21, %s2402_s3 }
  0x2d   : > { %p1736_p2 = pnand %p1734_p1, %p2014_p13 }
  0x2f   : > { %p1737_p6 = pneg %p1736_p2 }
  0x31   : > { %p1742_p3 = pnand %p1740_p10, %p1737_p6 }
  0x33   : > { %1745 = shalt.err (!%p1742_p3)
}
  0x34   : > { %s1746_s11 = scalar_lea.vmem %s2002_s14, 4096  ;;  %p1754_p12 = scmp.lt.s32.totalorder %s2002_s14, %s2002_s14 }
  0x35   : > { %p1747_p5 = scmp.ne.s32.totalorder %s2002_s14, %s1746_s11  ;;  %p1755_p0 = scmp.lt.s32.totalorder %s1746_s11, %s1746_s11 }
  0x37   : > { %p1749_p7 = pnand %p1747_p5, %p2014_p13  ;;  %p1756_p1 = por %p1755_p0, %p1754_p12 }
  0x39   : > { %p1750_p9 = pneg %p1749_p7 }
  0x3b   : > { %p1757_p2 = pnand %p1756_p1, %p1750_p9 }
  0x3d   : > { %1760 = shalt.err (!%p1757_p2)
}
  0x3e   : > { %1555 = dma.hbm_to_vmem [thread:$0]  (!%p1998_p11), %s2402_s3, 4096, %s2002_s14, [#allocation6], %s1898_s13, %s1898_s13, %s1899_s15  }
  0x3f   : > { %s1761_s20 = scalar_lea.hbm %s2404_s5, 2048 }
  0x40   : > { %p1762_p6 = scmp.ne.s32.totalorder %s2404_s5, %s1761_s20  ;;  %p1768_p5 = scmp.lt.u32.totalorder %s1761_s20, %s2404_s5 }
  0x42   : > { %p1764_p10 = pnand %p1762_p6, %p2014_p13 }
  0x44   : > { %p1765_p3 = pneg %p1764_p10 }
  0x46   : > { %p1770_p7 = pnand %p1768_p5, %p1765_p3 }
  0x48   : > { %1773 = shalt.err (!%p1770_p7)
}
  0x49   : > { %s1774_s11 = scalar_lea.vmem %s253_s16, 2048  ;;  %p1782_p1 = scmp.lt.s32.totalorder %s253_s16, %s253_s16 }
  0x4a   : > { %p1775_p9 = scmp.ne.s32.totalorder %s253_s16, %s1774_s11  ;;  %p1783_p2 = scmp.lt.s32.totalorder %s1774_s11, %s1774_s11 }
  0x4c   : > { %p1777_p12 = pnand %p1775_p9, %p2014_p13  ;;  %p1784_p4 = por %p1783_p2, %p1782_p1 }
  0x4e   : > { %p1778_p0 = pneg %p1777_p12 }
  0x50   : > { %p1785_p8 = pnand %p1784_p4, %p1778_p0 }
  0x52   : > { %1788 = shalt.err (!%p1785_p8)
}
  0x53   : > { %s1900_s14 = smov 64   ;;  %s1901_s22 = smov 4  }
  0x54   : > { %1558 = dma.hbm_to_vmem [thread:$0]  (!%p1998_p11), %s2404_s5, 2048, %s253_s16, [#allocation9], %s1900_s14, %s1900_s14, %s1901_s22  }
  0x55   : > { %s2084_s18 = sadd.s32 1, %s1893_s27   ;;  %s32_s20 = sadd.s32 1, %s1889_s26 }
  0x56   : > { %s29_s19 = ssub.s32 %s1893_s27, %s2084_s18  ;;  %p39_p8 = scmp.ne.s32.totalorder %s1889_s26, %s1885_s25 }
  0x57   : > { %p30_p4 = scmp.eq.s32.totalorder %s29_s19, 0  ;;  %p40_p13 = scmp.eq.s32.totalorder %s1893_s27, 0 }
  0x58   : > { %p1570_p6 = scmp.lt.s32.totalorder %s1893_s27, 2  ;;  %p2417_p3 = scmp.eq.s32.totalorder %s1968_s28, 1 }
  0x59   : > { %s2094_s21 = scalar_select %p30_p4, %s1889_s26, %s32_s20  }
  0x5a   : > { %p41_p10 = por %p40_p13, %p39_p8  ;;  %p2098_p5 = por %p2417_p3, %p39_p8 }
  0x5b   : > { %s269_s12 = sand.u32 1, %s1889_s26   ;;  %s1451_s29 = sshll.u32 %s1893_s27, 11 }
  0x5c   : > { %s1372_s16 = sshll.u32 %s269_s12, 7  ;;  %s2107_s14 = scalar_lea.hbm %s2399_s0, %s1451_s29 }
  0x5d   : > { %s273_s22 = scalar_lea.vmem [#allocation2], %s1372_s16  ;;  %p2109_p11 = pnand %p1570_p6, %p41_p10 }
  0x5e   : > { %s280_s8 = sshll.u32 %s273_s22, 4  ;;  %s2115_s19 = scalar_lea.sflag [#allocation3], %s269_s12  ;;  %s2113_s8 = int_to_ptr.vmem [resolvable:$true] %s280_s8 }
  0x5f   : > { %s1789_s20 = scalar_lea.hbm %s2107_s14, 2048  ;;  %p1791_p9 = pneg %p2109_p11 }
  0x60   : > { %p1790_p7 = scmp.ne.s32.totalorder %s2107_s14, %s1789_s20  ;;  %s1794_s10 = scalar_lea.hbm %s2399_s0, 4096 }
  0x61   : > { %p1795_p1 = scmp.lt.u32.totalorder %s2107_s14, %s2399_s0  ;;  %p1796_p2 = scmp.lt.u32.totalorder %s1794_s10, %s1789_s20 }
  0x62   : > { %p1792_p12 = pnand %p1791_p9, %p1790_p7  ;;  %p1798_p8 = scmp.lt.u32.totalorder %s1789_s20, %s2107_s14 }
  0x63   : > { %p1797_p4 = por %p1796_p2, %p1795_p1 }
  0x64   : > { %p1793_p0 = pneg %p1792_p12 }
  0x65   : > { %p1799_p13 = por %p1798_p8, %p1797_p4 }
  0x67   : > { %p1800_p6 = pnand %p1799_p13, %p1793_p0 }
  0x69   : > { %1803 = shalt.err (!%p1800_p6)
}
  0x6a   : > { %s1804_s12 = scalar_lea.vmem %s2113_s8, 2048  ;;  %s1902_s29 = smov [#allocation2]  }
  0x6b   : > { %p1805_p10 = scmp.ne.s32.totalorder %s2113_s8, %s1804_s12  ;;  %s1809_s16 = sshll.u32 %s1902_s29, 4  ;;  %s1810_s16 = int_to_ptr.vmem [resolvable:$false] %s1809_s16 }
  0x6c   : > { %s1811_s11 = scalar_lea.vmem %s1810_s16, 4096  ;;  %p1812_p12 = scmp.lt.s32.totalorder %s2113_s8, %s1810_s16 }
  0x6d   : > { %p1807_p3 = pnand %p1805_p10, %p1791_p9  ;;  %p1813_p1 = scmp.lt.s32.totalorder %s1811_s11, %s1804_s12 }
  0x6f   : > { %p1808_p7 = pneg %p1807_p3  ;;  %p1814_p2 = por %p1813_p1, %p1812_p12 }
  0x71   : > { %p1815_p4 = pnand %p1814_p2, %p1808_p7 }
  0x73   : > { %1818 = shalt.err (!%p1815_p4)
}
  0x74   : > { %1562 = dma.hbm_to_vmem [thread:$0]  (!%p2109_p11), %s2107_s14, 2048, %s2113_s8, %s2115_s19, %s1898_s13, %s1898_s13, %s1899_s15  }
  0x75   : > { %p2420_p9 = scmp.ne.s32.totalorder %s2414_s9, 0 }
  0x76   : > { %s2149_s20 = sand.u32 (!%p2420_p9), 1, %s1885_s25   ;;  %p2421_p0 = scmp.ne.s32.totalorder (!%p2420_p9), %s2411_s30, 0 }
  0x77   : > { %292 = sbr.rel (%p2420_p9) target bundleno = 901 (0x385), region = 48  ;;  %s1376_s10 = sshll.u32 (!%p2420_p9), %s2149_s20, 7 }
  0x78   : > { %s295_s22 = scalar_lea.sflag (!%p2420_p9), [#allocation3], %s2149_s20  ;;  %s2155_s17 = scalar_lea.vmem (!%p2420_p9), [#allocation2], %s1376_s10 }
  0x7e   : > { %1864 = dma.done.wait (%p2421_p0), %s295_s22, 2048  }
  0x7f   : > { %1866 = vsyncadd (%p2421_p0), %s295_s22, 4294965248  ;;  %p2422_p11 = scmp.eq.s32.totalorder %s1968_s28, 0 }
  0x81   : > { %1868 = dma.done.wait (%p2422_p11), [#allocation6], 6144   ;;  %p2423_p8 = pmov %p2422_p11 }
  0x83   : > { %1870 = vsyncadd (%p2423_p8), [#allocation6], 4294961152  ;;  %p2424_p13 = pmov %p2423_p8 }
  0x84   : > { %p2425_p6 = pmov %p2423_p8 }
  0x85   : > { %1872 = dma.done.wait (%p2424_p13), [#allocation9], 2048  }
  0x86   : > { %1874 = vsyncadd (%p2425_p6), [#allocation9], 4294965248  ;;  %v1903_v0 = vmov 0   ;;  %v1617_v1 = vld [vmem:[#allocation5 + $0x4] ss:$8 sps:$4 sm:$0xff]   ;;  %v346_v31 = vld [vmem:[%s2155_s17 + $0x10] sm:$0xff] }
  0x87   : > { %508 = vmatprep.mubr.bf16.mxu0 %v1903_v0  ;;  %v1619_v2 = vld [vmem:[#allocation5] ss:$8 sps:$4 sm:$0xff]   ;;  %476 = vmatprep.subr.bf16.mxu0 %v1617_v1  ;;  %v1620_v3 = vld [vmem:[#allocation5 + $0x14] ss:$8 sps:$4 sm:$0xff]   ;;  %v1622_v4 = vld [vmem:[#allocation5 + $0x10] ss:$8 sps:$4 sm:$0xff]  }
  0x88   : > { %477 = vmatpush1.bf16.msra.mxu0 %v1619_v2  ;;  %v1623_v5 = vld [vmem:[#allocation5 + $0x24] ss:$8 sps:$4 sm:$0xff]   ;;  %v1625_v6 = vld [vmem:[#allocation5 + $0x20] ss:$8 sps:$4 sm:$0xff]   ;;  %v1626_v7 = vld [vmem:[#allocation5 + $0x34] ss:$8 sps:$4 sm:$0xff]  }
  0x89   : > { %478 = vmatprep.subr.bf16.mxu0 %v1620_v3  ;;  %v1628_v8 = vld [vmem:[#allocation5 + $0x30] ss:$8 sps:$4 sm:$0xff]   ;;  %v1629_v9 = vld [vmem:[#allocation5 + $0x44] ss:$8 sps:$4 sm:$0xff]   ;;  %v1631_v10 = vld [vmem:[#allocation5 + $0x40] ss:$8 sps:$4 sm:$0xff]  }
  0x8a   : > { %v1632_v11 = vld [vmem:[#allocation5 + $0x54] ss:$8 sps:$4 sm:$0xff]   ;;  %v1641_v12 = vld [vmem:[#allocation7 + $0x4] ss:$8 sps:$4 sm:$0xff]   ;;  %v1643_v13 = vld [vmem:[#allocation7] ss:$8 sps:$4 sm:$0xff]  }
  0x8b   : > { %v1634_v14 = vld [vmem:[#allocation5 + $0x50] ss:$8 sps:$4 sm:$0xff]   ;;  %841 = vmatprep.subr.bf16.mxu1 %v1641_v12  ;;  %v1644_v15 = vld [vmem:[#allocation7 + $0x14] ss:$8 sps:$4 sm:$0xff]   ;;  %v1635_v16 = vld [vmem:[#allocation5 + $0x64] ss:$8 sps:$4 sm:$0xff]  }
  0x8c   : > { %479 = vmatpush1.bf16.msra.mxu0 %v1622_v4  ;;  %842 = vmatpush1.bf16.msra.mxu1 %v1643_v13  ;;  %v1646_v17 = vld [vmem:[#allocation7 + $0x10] ss:$8 sps:$4 sm:$0xff]   ;;  %v1647_v18 = vld [vmem:[#allocation7 + $0x24] ss:$8 sps:$4 sm:$0xff]   ;;  %v1637_v19 = vld [vmem:[#allocation5 + $0x60] ss:$8 sps:$4 sm:$0xff]  }
  0x8d   : > { %480 = vmatprep.subr.bf16.mxu0 %v1623_v5  ;;  %843 = vmatprep.subr.bf16.mxu1 %v1644_v15  ;;  %v1638_v20 = vld [vmem:[#allocation5 + $0x74] ss:$8 sps:$4 sm:$0xff]   ;;  %v1649_v21 = vld [vmem:[#allocation7 + $0x20] ss:$8 sps:$4 sm:$0xff]   ;;  %v1640_v23 = vld [vmem:[#allocation5 + $0x70] ss:$8 sps:$4 sm:$0xff]  }
  0x8e   : > { %v1650_v22 = vld [vmem:[#allocation7 + $0x34] ss:$8 sps:$4 sm:$0xff]   ;;  %v344_v24 = vld [vmem:[%s2155_s17] sm:$0xff]  ;;  %v345_v25 = vld [vmem:[%s2155_s17 + $0x8] sm:$0xff]  ;;  %s2315_s19 = scalar_lea.vmem [#allocation10], %s1376_s10  ;;  %s1452_s12 = sshll.u32 %s1968_s28, 11 }
  0x8f   : > { %v1652_v26 = vld [vmem:[#allocation7 + $0x30] ss:$8 sps:$4 sm:$0xff]   ;;  %v1653_v27 = vld [vmem:[#allocation7 + $0x44] ss:$8 sps:$4 sm:$0xff]   ;;  %v377_v28 = vpack.c.bf16 %v345_v25, %v344_v24  ;;  %v1655_v29 = vld [vmem:[#allocation7 + $0x40] ss:$8 sps:$4 sm:$0xff]   ;;  %s2350_s10 = scalar_lea.hbm %s2406_s7, %s1452_s12 }
  0x90   : > { %481 = vmatpush1.bf16.msra.mxu0 %v1625_v6  ;;  %844 = vmatpush1.bf16.msra.mxu1 %v1646_v17  ;;  %v1656_v30 = vld [vmem:[#allocation7 + $0x54] ss:$8 sps:$4 sm:$0xff]   ;;  %v1658_v33 = vld [vmem:[#allocation7 + $0x50] ss:$8 sps:$4 sm:$0xff]   ;;  %v1659_v34 = vld [vmem:[#allocation7 + $0x64] ss:$8 sps:$4 sm:$0xff]  }
  0x91   : > { %482 = vmatprep.subr.bf16.mxu0 %v1626_v7  ;;  %845 = vmatprep.subr.bf16.mxu1 %v1647_v18  ;;  %v347_v32 = vld [vmem:[%s2155_s17 + $0x18] sm:$0xff]  ;;  %v1661_v35 = vld [vmem:[#allocation7 + $0x60] ss:$8 sps:$4 sm:$0xff]   ;;  %v1665_v41 = vld [vmem:[#allocation7 + $0x84] ss:$8 sps:$4 sm:$0xff]   ;;  %s1264_s29 = sshll.u32 %s2315_s19, 4  ;;  %s2352_s29 = int_to_ptr.vmem [resolvable:$true] %s1264_s29 }
  0x92   : > { %v378_v36 = vpack.c.bf16 %v347_v32, %v346_v31  ;;  %v1662_v37 = vld [vmem:[#allocation7 + $0x74] ss:$8 sps:$4 sm:$0xff]   ;;  %v348_v38 = vld [vmem:[%s2155_s17 + $0x20] sm:$0xff]  ;;  %v349_v39 = vld [vmem:[%s2155_s17 + $0x28] sm:$0xff]  ;;  %s1251_s28 = scalar_lea.sflag [#allocation4], %s2149_s20  ;;  %s1819_s22 = scalar_lea.vmem %s2352_s29, 2048 }
  0x93   : > { %v1664_v40 = vld [vmem:[#allocation7 + $0x70] ss:$8 sps:$4 sm:$0xff]   ;;  %v379_v42 = vpack.c.bf16 %v349_v39, %v348_v38  ;;  %v1667_v43 = vld [vmem:[#allocation7 + $0x80] ss:$8 sps:$4 sm:$0xff]   ;;  %v1668_v44 = vld [vmem:[#allocation7 + $0x94] ss:$8 sps:$4 sm:$0xff]   ;;  %p1820_p10 = scmp.ne.s32.totalorder %s2352_s29, %s1819_s22 }
  0x94   : > { %483 = vmatpush1.bf16.msra.mxu0 %v1628_v8  ;;  %846 = vmatpush1.bf16.msra.mxu1 %v1649_v21  ;;  %v350_v45 = vld [vmem:[%s2155_s17 + $0x30] sm:$0xff]  ;;  %v351_v46 = vld [vmem:[%s2155_s17 + $0x38] sm:$0xff]  ;;  %v1671_v48 = vld [vmem:[#allocation7 + $0xa4] ss:$8 sps:$4 sm:$0xff]  }
  0x95   : > { %484 = vmatprep.subr.bf16.mxu0 %v1629_v9  ;;  %847 = vmatprep.subr.bf16.mxu1 %v1650_v22  ;;  %v1670_v47 = vld [vmem:[#allocation7 + $0x90] ss:$8 sps:$4 sm:$0xff]   ;;  %v380_v49 = vpack.c.bf16 %v351_v46, %v350_v45  ;;  %v1673_v50 = vld [vmem:[#allocation7 + $0xa0] ss:$8 sps:$4 sm:$0xff]   ;;  %v1674_v51 = vld [vmem:[#allocation7 + $0xb4] ss:$8 sps:$4 sm:$0xff]   ;;  %p1821_p3 = pnand %p1820_p10, %p2098_p5 }
  0x96   : > { %v352_v52 = vld [vmem:[%s2155_s17 + $0x40] sm:$0xff]  ;;  %v353_v53 = vld [vmem:[%s2155_s17 + $0x48] sm:$0xff]  ;;  %v1676_v54 = vld [vmem:[#allocation7 + $0xb0] ss:$8 sps:$4 sm:$0xff]  }
  0x97   : > { %v1677_v55 = vld [vmem:[#allocation7 + $0xc4] ss:$8 sps:$4 sm:$0xff]   ;;  %v381_v56 = vpack.c.bf16 %v353_v53, %v352_v52  ;;  %v1679_v57 = vld [vmem:[#allocation7 + $0xc0] ss:$8 sps:$4 sm:$0xff]   ;;  %v1680_v58 = vld [vmem:[#allocation7 + $0xd4] ss:$8 sps:$4 sm:$0xff]   ;;  %p1822_p7 = pneg %p1821_p3 }
  0x98   : > { %485 = vmatpush1.bf16.msra.mxu0 %v1631_v10  ;;  %848 = vmatpush1.bf16.msra.mxu1 %v1652_v26  ;;  %v354_v59 = vld [vmem:[%s2155_s17 + $0x50] sm:$0xff]  ;;  %v355_v60 = vld [vmem:[%s2155_s17 + $0x58] sm:$0xff]  ;;  %v356_v62 = vld [vmem:[%s2155_s17 + $0x60] sm:$0xff] }
  0x99   : > { %486 = vmatprep.subr.bf16.mxu0 %v1632_v11  ;;  %849 = vmatprep.subr.bf16.mxu1 %v1653_v27  ;;  %v382_v61 = vpack.c.bf16 %v355_v60, %v354_v59  ;;  %v357_v63 = vld [vmem:[%s2155_s17 + $0x68] sm:$0xff]  ;;  %v358_v2 = vld [vmem:[%s2155_s17 + $0x70] sm:$0xff]  ;;  %v359_v3 = vld [vmem:[%s2155_s17 + $0x78] sm:$0xff]  ;;  %s1904_s17 = smov [#allocation10]  }
  0x9a   : > { %v383_v1 = vpack.c.bf16 %v357_v63, %v356_v62  ;;  %v384_v4 = vpack.c.bf16 %v359_v3, %v358_v2  ;;  %v1682_v5 = vld [vmem:[#allocation7 + $0xd0] ss:$8 sps:$4 sm:$0xff]   ;;  %v1683_v6 = vld [vmem:[#allocation7 + $0xe4] ss:$8 sps:$4 sm:$0xff]   ;;  %v1685_v7 = vld [vmem:[#allocation7 + $0xe0] ss:$8 sps:$4 sm:$0xff]  }
  0x9b   : > { %v1686_v8 = vld [vmem:[#allocation7 + $0xf4] ss:$8 sps:$4 sm:$0xff]   ;;  %v1688_v9 = vld [vmem:[#allocation7 + $0xf0] ss:$8 sps:$4 sm:$0xff]   ;;  %v1689_v10 = vld [vmem:[#allocation8 + $0x40] sm:$0xff]   ;;  %s1823_s30 = sshll.u32 %s1904_s17, 4  ;;  %s1824_s30 = int_to_ptr.vmem [resolvable:$false] %s1823_s30 }
  0x9c   : > { %487 = vmatpush1.bf16.msra.mxu0 %v1634_v14  ;;  %850 = vmatpush1.bf16.msra.mxu1 %v1655_v29  ;;  %v1690_v11 = vld [vmem:[#allocation8] sm:$0xff]   ;;  %v1691_v12 = vld [vmem:[#allocation8 + $0x48] sm:$0xff]   ;;  %v1693_v13 = vld [vmem:[#allocation8 + $0x50] sm:$0xff]   ;;  %s1825_s9 = scalar_lea.vmem %s1824_s30, 4096  ;;  %p1826_p12 = scmp.lt.s32.totalorder %s2352_s29, %s1824_s30 }
  0x9d   : > { %488 = vmatprep.subr.bf16.mxu0 %v1635_v16  ;;  %851 = vmatprep.subr.bf16.mxu1 %v1656_v30  ;;  %v2193_v14 = vld [vmem:[#allocation8 + $0x10] sm:$0xff]   ;;  %v2195_v15 = vld [vmem:[#allocation8 + $0x58] sm:$0xff]   ;;  %v2201_v17 = vld [vmem:[#allocation8 + $0x60] sm:$0xff]   ;;  %p1827_p1 = scmp.lt.s32.totalorder %s1825_s9, %s1819_s22 }
  0x9e   : > { %v2198_v16 = vld [vmem:[#allocation8 + $0x18] sm:$0xff]   ;;  %v2204_v18 = vld [vmem:[#allocation8 + $0x20] sm:$0xff]  }
  0x9f   : > { %p1828_p2 = por %p1827_p1, %p1826_p12 }
  0xa0   : > { %489 = vmatpush1.bf16.msra.mxu0 %v1637_v19  ;;  %852 = vmatpush1.bf16.msra.mxu1 %v1658_v33  ;;  %v2207_v19 = vld [vmem:[#allocation8 + $0x68] sm:$0xff]  }
  0xa1   : > { %490 = vmatprep.subr.bf16.mxu0 %v1638_v20  ;;  %853 = vmatprep.subr.bf16.mxu1 %v1659_v34  ;;  %v386_v20 = vlaneseq  ;;  %p1829_p4 = pnand %p1828_p2, %p1822_p7 }
  0xa3   : > { %v2211_v21 = vshrl.u32 %v386_v20, 7 }
  0xa4   : > { %491 = vmatpush1.bf16.msra.mxu0 %v1640_v23  ;;  %854 = vmatpush1.bf16.msra.mxu1 %v1661_v35  ;;  %v376_v23 = vld [vmem:[%s2401_s2] sm:$0x3] }
  0xa5   : > { %855 = vmatprep.subr.bf16.mxu1 %v1662_v37  ;;  %1453 = vmatprep.subr.bf16.mxu0 %v1689_v10  ;;  %v388_v22 = vsub.s32 0, %v2211_v21  ;;  %v392_v24 = vsub.s32 1, %v2211_v21 }
  0xa7   : > { %509 = vmatmul.mubr.bf16.vlgmr.msra.gmra.mrb[0].mxu0 %v377_v28  ;;  %v2220_v25 = vrot.slane %v376_v23, %v388_v22  ;;  %v2224_v26 = vrot.slane %v376_v23, %v392_v24 }
  0xa8   : > { %518 = vmatprep.mubr.bf16.mxu0 %v1903_v0  ;;  %856 = vmatpush1.bf16.msra.mxu1 %v1664_v40 }
  0xa9   : > { %857 = vmatprep.subr.bf16.mxu1 %v1665_v41  ;;  %1454 = vmatpush3.bf16.msra.mxu0 %v1690_v11 }
  0xaa   : > { %1455 = vmatprep.subr.bf16.mxu0 %v1691_v12 }
  0xac   : > { %858 = vmatpush1.bf16.msra.mxu1 %v1667_v43 }
  0xad   : > { %859 = vmatprep.subr.bf16.mxu1 %v1668_v44 }
  0xaf   : > { %519 = vmatmul.mubr.bf16.gmra.mrb[4].mxu0 %v378_v36 }
  0xb0   : > { %528 = vmatprep.mubr.bf16.mxu0 %v1903_v0  ;;  %860 = vmatpush1.bf16.msra.mxu1 %v1670_v47 }
  0xb1   : > { %861 = vmatprep.subr.bf16.mxu1 %v1671_v48 }
  0xb4   : > { %862 = vmatpush1.bf16.msra.mxu1 %v1673_v50 }
  0xb5   : > { %863 = vmatprep.subr.bf16.mxu1 %v1674_v51 }
  0xb7   : > { %529 = vmatmul.mubr.bf16.gmra.mrb[8].mxu0 %v379_v42 }
  0xb8   : > { %538 = vmatprep.mubr.bf16.mxu0 %v1903_v0  ;;  %864 = vmatpush1.bf16.msra.mxu1 %v1676_v54 }
  0xb9   : > { %865 = vmatprep.subr.bf16.mxu1 %v1677_v55 }
  0xbc   : > { %866 = vmatpush1.bf16.msra.mxu1 %v1679_v57 }
  0xbd   : > { %867 = vmatprep.subr.bf16.mxu1 %v1680_v58 }
  0xbf   : > { %539 = vmatmul.mubr.bf16.gmra.mrb[12].mxu0 %v380_v49 }
  0xc0   : > { %548 = vmatprep.mubr.bf16.mxu0 %v1903_v0  ;;  %868 = vmatpush1.bf16.msra.mxu1 %v1682_v5 }
  0xc1   : > { %869 = vmatprep.subr.bf16.mxu1 %v1683_v6 }
  0xc4   : > { %870 = vmatpush1.bf16.msra.mxu1 %v1685_v7 }
  0xc5   : > { %871 = vmatprep.subr.bf16.mxu1 %v1686_v8 }
  0xc7   : > { %549 = vmatmul.mubr.bf16.gmra.mrb[16].mxu0 %v381_v56 }
  0xc8   : > { %558 = vmatprep.mubr.bf16.mxu0 %v1903_v0  ;;  %872 = vmatpush1.bf16.msra.mxu1 %v1688_v9 }
  0xc9   : > { %1517 = vmatprep.subr.bf16.mxu1 %v1689_v10 }
  0xcf   : > { %559 = vmatmul.mubr.bf16.gmra.mrb[20].mxu0 %v382_v61 }
  0xd0   : > { %568 = vmatprep.mubr.bf16.mxu0 %v1903_v0 }
  0xd7   : > { %569 = vmatmul.mubr.bf16.gmra.mrb[24].mxu0 %v383_v1 }
  0xd8   : > { %578 = vmatprep.mubr.bf16.mxu0 %v1903_v0  ;;  %v1692_v0 = vld [vmem:[#allocation8 + $0x8] sm:$0xff]  }
  0xd9   : > { %1456 = vmatpush3.bf16.msra.mxu0 %v1692_v0 }
  0xda   : > { %1457 = vmatprep.subr.bf16.mxu0 %v1693_v13 }
  0xdd   : > { %1458 = vmatpush3.bf16.msra.mxu0 %v2193_v14 }
  0xde   : > { %1459 = vmatprep.subr.bf16.mxu0 %v2195_v15 }
  0xdf   : > { %579 = vmatmul.mubr.bf16.gmra.mrb[28].mxu0 %v384_v4 }
  0xe1   : > { %1460 = vmatpush3.bf16.msra.mxu0 %v2198_v16 }
  0xe2   : > { %1461 = vmatprep.subr.bf16.mxu0 %v2201_v17 }
  0xe5   : > { %1462 = vmatpush3.bf16.msra.mxu0 %v2204_v18 }
  0xe6   : > { %1463 = vmatprep.subr.bf16.mxu0 %v2207_v19 }
 0x17a   : > { %v510_v27 = vpop.f32.mrb[0].mxu0 }
 0x17b   : > { %v511_v28 = vadd.f32 %v510_v27, %v2220_v25  ;;  %v512_v29 = vpop.f32.mrb[1].mxu0 }
 0x17c   : > { %v513_v30 = vadd.f32 %v512_v29, %v2224_v26  ;;  %v514_v31 = vpop.f32.mrb[2].mxu0 }
 0x17d   : > { %v515_v32 = vadd.f32 %v514_v31, %v2220_v25  ;;  %v516_v33 = vpop.f32.mrb[3].mxu0  ;;  %v589_v35 = vmax.f32 %v511_v28, 0.0 }
 0x17e   : > { %v517_v34 = vadd.f32 %v516_v33, %v2224_v26  ;;  %v590_v37 = vmax.f32 %v513_v30, 0.0 }
 0x17f   : > { %v591_v36 = vmax.f32 %v515_v32, 0.0 }
 0x180   : > { %v592_v38 = vmax.f32 %v517_v34, 0.0 }
 0x181   : > { %v621_v39 = vpack.c.bf16 %v591_v36, %v589_v35 }
 0x182   : > { %v520_v40 = vpop.f32.mrb[4].mxu0  ;;  %v622_v41 = vpack.c.bf16 %v592_v38, %v590_v37 }
 0x183   : > { %v521_v42 = vadd.f32 %v520_v40, %v2220_v25  ;;  %v522_v43 = vpop.f32.mrb[5].mxu0 }
 0x184   : > { %v523_v44 = vadd.f32 %v522_v43, %v2224_v26  ;;  %v524_v45 = vpop.f32.mrb[6].mxu0  ;;  %873 = vmatprep.mubr.bf16.mxu1 %v622_v41 }
 0x185   : > { %v525_v46 = vadd.f32 %v524_v45, %v2220_v25  ;;  %v526_v47 = vpop.f32.mrb[7].mxu0  ;;  %874 = vmatmul.mubr.bf16.vlgmr.msra.gmra.mrb[0].mxu1 %v621_v39  ;;  %v593_v49 = vmax.f32 %v521_v42, 0.0 }
 0x186   : > { %v527_v48 = vadd.f32 %v526_v47, %v2224_v26  ;;  %1525 = vmatpush3.bf16.msra.mxu1 %v1690_v11  ;;  %v594_v51 = vmax.f32 %v523_v44, 0.0 }
 0x187   : > { %v595_v50 = vmax.f32 %v525_v46, 0.0  ;;  %1518 = vmatprep.subr.bf16.mxu1 %v1691_v12 }
 0x188   : > { %v596_v52 = vmax.f32 %v527_v48, 0.0 }
 0x189   : > { %v623_v53 = vpack.c.bf16 %v595_v50, %v593_v49 }
 0x18a   : > { %v624_v54 = vpack.c.bf16 %v596_v52, %v594_v51  ;;  %v530_v55 = vpop.f32.mrb[8].mxu0  ;;  %1526 = vmatpush3.bf16.msra.mxu1 %v1692_v0 }
 0x18b   : > { %v531_v56 = vadd.f32 %v530_v55, %v2220_v25  ;;  %v532_v57 = vpop.f32.mrb[9].mxu0  ;;  %1519 = vmatprep.subr.bf16.mxu1 %v1693_v13 }
 0x18c   : > { %v533_v58 = vadd.f32 %v532_v57, %v2224_v26  ;;  %v534_v59 = vpop.f32.mrb[10].mxu0  ;;  %883 = vmatprep.mubr.bf16.mxu1 %v624_v54 }
 0x18d   : > { %v535_v60 = vadd.f32 %v534_v59, %v2220_v25  ;;  %v536_v61 = vpop.f32.mrb[11].mxu0  ;;  %884 = vmatmul.mubr.bf16.gmra.mrb[4].mxu1 %v623_v53  ;;  %v597_v63 = vmax.f32 %v531_v56, 0.0 }
 0x18e   : > { %v537_v62 = vadd.f32 %v536_v61, %v2224_v26  ;;  %1527 = vmatpush3.bf16.msra.mxu1 %v2193_v14  ;;  %v598_v2 = vmax.f32 %v533_v58, 0.0 }
 0x18f   : > { %v599_v1 = vmax.f32 %v535_v60, 0.0  ;;  %1520 = vmatprep.subr.bf16.mxu1 %v2195_v15 }
 0x190   : > { %v600_v3 = vmax.f32 %v537_v62, 0.0 }
 0x191   : > { %v625_v4 = vpack.c.bf16 %v599_v1, %v597_v63 }
 0x192   : > { %v626_v5 = vpack.c.bf16 %v600_v3, %v598_v2  ;;  %v540_v6 = vpop.f32.mrb[12].mxu0  ;;  %1528 = vmatpush3.bf16.msra.mxu1 %v2198_v16 }
 0x193   : > { %v541_v7 = vadd.f32 %v540_v6, %v2220_v25  ;;  %v542_v8 = vpop.f32.mrb[13].mxu0  ;;  %1521 = vmatprep.subr.bf16.mxu1 %v2201_v17 }
 0x194   : > { %v543_v9 = vadd.f32 %v542_v8, %v2224_v26  ;;  %v544_v10 = vpop.f32.mrb[14].mxu0  ;;  %893 = vmatprep.mubr.bf16.mxu1 %v626_v5 }
 0x195   : > { %v545_v11 = vadd.f32 %v544_v10, %v2220_v25  ;;  %v546_v12 = vpop.f32.mrb[15].mxu0  ;;  %894 = vmatmul.mubr.bf16.gmra.mrb[8].mxu1 %v625_v4  ;;  %v601_v13 = vmax.f32 %v541_v7, 0.0 }
 0x196   : > { %v547_v0 = vadd.f32 %v546_v12, %v2224_v26  ;;  %1529 = vmatpush3.bf16.msra.mxu1 %v2204_v18  ;;  %v602_v15 = vmax.f32 %v543_v9, 0.0 }
 0x197   : > { %v603_v14 = vmax.f32 %v545_v11, 0.0  ;;  %1522 = vmatprep.subr.bf16.mxu1 %v2207_v19 }
 0x198   : > { %v604_v16 = vmax.f32 %v547_v0, 0.0 }
 0x199   : > { %v627_v20 = vpack.c.bf16 %v603_v14, %v601_v13 }
 0x19a   : > { %v628_v17 = vpack.c.bf16 %v604_v16, %v602_v15  ;;  %v550_v23 = vpop.f32.mrb[16].mxu0  ;;  %v1700_v16 = vld [vmem:[#allocation8 + $0x28] sm:$0xff]  }
 0x19b   : > { %v551_v27 = vadd.f32 %v550_v23, %v2220_v25  ;;  %v552_v28 = vpop.f32.mrb[17].mxu0  ;;  %1464 = vmatpush3.bf16.msra.mxu0 %v1700_v16  ;;  %1530 = vmatpush3.bf16.msra.mxu1 %v1700_v16  ;;  %v1704_v23 = vld [vmem:[#allocation8 + $0x38] sm:$0xff]  }
 0x19c   : > { %v553_v29 = vadd.f32 %v552_v28, %v2224_v26  ;;  %v554_v30 = vpop.f32.mrb[18].mxu0  ;;  %903 = vmatprep.mubr.bf16.mxu1 %v628_v17  ;;  %v1702_v17 = vld [vmem:[#allocation8 + $0x30] sm:$0xff]  }
 0x19d   : > { %v555_v31 = vadd.f32 %v554_v30, %v2220_v25  ;;  %v556_v32 = vpop.f32.mrb[19].mxu0  ;;  %904 = vmatmul.mubr.bf16.gmra.mrb[12].mxu1 %v627_v20  ;;  %v605_v33 = vmax.f32 %v551_v27, 0.0  ;;  %v1701_v20 = vld [vmem:[#allocation8 + $0x70] sm:$0xff]  }
 0x19e   : > { %v557_v18 = vadd.f32 %v556_v32, %v2224_v26  ;;  %v606_v34 = vmax.f32 %v553_v29, 0.0  ;;  %1465 = vmatprep.subr.bf16.mxu0 %v1701_v20  ;;  %1523 = vmatprep.subr.bf16.mxu1 %v1701_v20 }
 0x19f   : > { %v607_v19 = vmax.f32 %v555_v31, 0.0  ;;  %1466 = vmatpush3.bf16.msra.mxu0 %v1702_v17  ;;  %1531 = vmatpush3.bf16.msra.mxu1 %v1702_v17 }
 0x1a0   : > { %v608_v35 = vmax.f32 %v557_v18, 0.0 }
 0x1a1   : > { %v629_v36 = vpack.c.bf16 %v607_v19, %v605_v33 }
 0x1a2   : > { %v630_v37 = vpack.c.bf16 %v608_v35, %v606_v34  ;;  %v560_v38 = vpop.f32.mrb[20].mxu0 }
 0x1a3   : > { %v561_v39 = vadd.f32 %v560_v38, %v2220_v25  ;;  %v562_v40 = vpop.f32.mrb[21].mxu0 }
 0x1a4   : > { %v563_v41 = vadd.f32 %v562_v40, %v2224_v26  ;;  %v564_v42 = vpop.f32.mrb[22].mxu0  ;;  %913 = vmatprep.mubr.bf16.mxu1 %v630_v37 }
 0x1a5   : > { %v565_v43 = vadd.f32 %v564_v42, %v2220_v25  ;;  %v566_v44 = vpop.f32.mrb[23].mxu0  ;;  %914 = vmatmul.mubr.bf16.gmra.mrb[16].mxu1 %v629_v36  ;;  %v609_v46 = vmax.f32 %v561_v39, 0.0 }
 0x1a6   : > { %v567_v45 = vadd.f32 %v566_v44, %v2224_v26  ;;  %v610_v48 = vmax.f32 %v563_v41, 0.0 }
 0x1a7   : > { %v611_v47 = vmax.f32 %v565_v43, 0.0 }
 0x1a8   : > { %v612_v49 = vmax.f32 %v567_v45, 0.0 }
 0x1a9   : > { %v631_v50 = vpack.c.bf16 %v611_v47, %v609_v46 }
 0x1aa   : > { %v632_v51 = vpack.c.bf16 %v612_v49, %v610_v48  ;;  %v570_v52 = vpop.f32.mrb[24].mxu0 }
 0x1ab   : > { %v571_v53 = vadd.f32 %v570_v52, %v2220_v25  ;;  %v572_v54 = vpop.f32.mrb[25].mxu0 }
 0x1ac   : > { %v573_v55 = vadd.f32 %v572_v54, %v2224_v26  ;;  %v574_v56 = vpop.f32.mrb[26].mxu0  ;;  %923 = vmatprep.mubr.bf16.mxu1 %v632_v51 }
 0x1ad   : > { %v575_v57 = vadd.f32 %v574_v56, %v2220_v25  ;;  %v576_v58 = vpop.f32.mrb[27].mxu0  ;;  %924 = vmatmul.mubr.bf16.gmra.mrb[20].mxu1 %v631_v50  ;;  %v613_v60 = vmax.f32 %v571_v53, 0.0 }
 0x1ae   : > { %v577_v59 = vadd.f32 %v576_v58, %v2224_v26  ;;  %v614_v62 = vmax.f32 %v573_v55, 0.0 }
 0x1af   : > { %v615_v61 = vmax.f32 %v575_v57, 0.0 }
 0x1b0   : > { %v616_v63 = vmax.f32 %v577_v59, 0.0 }
 0x1b1   : > { %v633_v1 = vpack.c.bf16 %v615_v61, %v613_v60 }
 0x1b2   : > { %v634_v2 = vpack.c.bf16 %v616_v63, %v614_v62  ;;  %v580_v3 = vpop.f32.mrb[28].mxu0 }
 0x1b3   : > { %v581_v4 = vadd.f32 %v580_v3, %v2220_v25  ;;  %v582_v5 = vpop.f32.mrb[29].mxu0 }
 0x1b4   : > { %v583_v6 = vadd.f32 %v582_v5, %v2224_v26  ;;  %v584_v7 = vpop.f32.mrb[30].mxu0  ;;  %933 = vmatprep.mubr.bf16.mxu1 %v634_v2 }
 0x1b5   : > { %v585_v8 = vadd.f32 %v584_v7, %v2220_v25  ;;  %v586_v9 = vpop.f32.mrb[31].mxu0  ;;  %934 = vmatmul.mubr.bf16.gmra.mrb[24].mxu1 %v633_v1  ;;  %v617_v11 = vmax.f32 %v581_v4, 0.0  ;;  %v1703_v25 = vld [vmem:[#allocation8 + $0x78] sm:$0xff]  }
 0x1b6   : > { %v587_v10 = vadd.f32 %v586_v9, %v2224_v26  ;;  %v618_v0 = vmax.f32 %v583_v6, 0.0  ;;  %1467 = vmatprep.subr.bf16.mxu0 %v1703_v25  ;;  %1524 = vmatprep.subr.bf16.mxu1 %v1703_v25  ;;  %v669_v26 = vld [vmem:[%s2403_s4] sm:$0x3] }
 0x1b7   : > { %v619_v12 = vmax.f32 %v585_v8, 0.0  ;;  %1468 = vmatpush3.bf16.msra.mxu0 %v1704_v23  ;;  %1532 = vmatpush3.bf16.msra.mxu1 %v1704_v23  ;;  %v2269_v27 = vrot.slane %v669_v26, %v388_v22  ;;  %v2273_v28 = vrot.slane %v669_v26, %v392_v24 }
 0x1b8   : > { %v620_v13 = vmax.f32 %v587_v10, 0.0 }
 0x1b9   : > { %v635_v14 = vpack.c.bf16 %v619_v12, %v617_v11 }
 0x1ba   : > { %v636_v15 = vpack.c.bf16 %v620_v13, %v618_v0 }
 0x1bc   : > { %943 = vmatprep.mubr.bf16.mxu1 %v636_v15 }
 0x1bd   : > { %944 = vmatmul.mubr.bf16.gmra.mrb[28].mxu1 %v635_v14 }
 0x258   : > { %v875_v29 = vpop.f32.mrb[0].mxu1 }
 0x259   : > { %v876_v30 = vadd.f32 %v875_v29, %v2269_v27  ;;  %v877_v31 = vpop.f32.mrb[1].mxu1 }
 0x25a   : > { %v878_v32 = vadd.f32 %v877_v31, %v2273_v28  ;;  %v879_v18 = vpop.f32.mrb[2].mxu1 }
 0x25b   : > { %v880_v33 = vadd.f32 %v879_v18, %v2269_v27  ;;  %v881_v19 = vpop.f32.mrb[3].mxu1  ;;  %v954_v35 = vmax.f32 %v876_v30, 0.0 }
 0x25c   : > { %v882_v34 = vadd.f32 %v881_v19, %v2273_v28  ;;  %v955_v22 = vmax.f32 %v878_v32, 0.0 }
 0x25d   : > { %v956_v36 = vmax.f32 %v880_v33, 0.0 }
 0x25e   : > { %v957_v37 = vmax.f32 %v882_v34, 0.0 }
 0x25f   : > { %v986_v38 = vpack.c.bf16 %v956_v36, %v954_v35 }
 0x260   : > { %v987_v21 = vpack.c.bf16 %v957_v37, %v955_v22  ;;  %v885_v24 = vpop.f32.mrb[4].mxu1 }
 0x261   : > { %v886_v39 = vadd.f32 %v885_v24, %v2269_v27  ;;  %v887_v40 = vpop.f32.mrb[5].mxu1 }
 0x262   : > { %v888_v41 = vadd.f32 %v887_v40, %v2273_v28  ;;  %v889_v42 = vpop.f32.mrb[6].mxu1  ;;  %1169 = vmatprep.mubr.bf16.mxu0 %v987_v21 }
 0x263   : > { %v890_v43 = vadd.f32 %v889_v42, %v2269_v27  ;;  %v891_v44 = vpop.f32.mrb[7].mxu1  ;;  %1170 = vmatmul.mubr.bf16.vlgmr.msra.gmra.mrb[32].mxu0 %v986_v38  ;;  %v958_v46 = vmax.f32 %v886_v39, 0.0 }
 0x264   : > { %v892_v45 = vadd.f32 %v891_v44, %v2273_v28  ;;  %v959_v48 = vmax.f32 %v888_v41, 0.0 }
 0x265   : > { %v960_v47 = vmax.f32 %v890_v43, 0.0 }
 0x266   : > { %v961_v49 = vmax.f32 %v892_v45, 0.0 }
 0x267   : > { %v988_v50 = vpack.c.bf16 %v960_v47, %v958_v46 }
 0x268   : > { %v989_v51 = vpack.c.bf16 %v961_v49, %v959_v48  ;;  %v895_v52 = vpop.f32.mrb[8].mxu1 }
 0x269   : > { %v896_v53 = vadd.f32 %v895_v52, %v2269_v27  ;;  %v897_v54 = vpop.f32.mrb[9].mxu1 }
 0x26a   : > { %v898_v55 = vadd.f32 %v897_v54, %v2273_v28  ;;  %v899_v56 = vpop.f32.mrb[10].mxu1  ;;  %1177 = vmatprep.mubr.bf16.mxu0 %v989_v51 }
 0x26b   : > { %v900_v57 = vadd.f32 %v899_v56, %v2269_v27  ;;  %v901_v58 = vpop.f32.mrb[11].mxu1  ;;  %1178 = vmatmul.mubr.bf16.gmra.mrb[36].mxu0 %v988_v50  ;;  %v962_v60 = vmax.f32 %v896_v53, 0.0 }
 0x26c   : > { %v902_v59 = vadd.f32 %v901_v58, %v2273_v28  ;;  %v963_v62 = vmax.f32 %v898_v55, 0.0 }
 0x26d   : > { %v964_v61 = vmax.f32 %v900_v57, 0.0 }
 0x26e   : > { %v965_v63 = vmax.f32 %v902_v59, 0.0 }
 0x26f   : > { %v990_v1 = vpack.c.bf16 %v964_v61, %v962_v60 }
 0x270   : > { %v991_v2 = vpack.c.bf16 %v965_v63, %v963_v62  ;;  %v905_v3 = vpop.f32.mrb[12].mxu1 }
 0x271   : > { %v906_v4 = vadd.f32 %v905_v3, %v2269_v27  ;;  %v907_v5 = vpop.f32.mrb[13].mxu1 }
 0x272   : > { %v908_v6 = vadd.f32 %v907_v5, %v2273_v28  ;;  %v909_v7 = vpop.f32.mrb[14].mxu1  ;;  %1185 = vmatprep.mubr.bf16.mxu0 %v991_v2 }
 0x273   : > { %v910_v8 = vadd.f32 %v909_v7, %v2269_v27  ;;  %v911_v9 = vpop.f32.mrb[15].mxu1  ;;  %1186 = vmatmul.mubr.bf16.gmra.mrb[40].mxu0 %v990_v1  ;;  %v966_v11 = vmax.f32 %v906_v4, 0.0 }
 0x274   : > { %v912_v10 = vadd.f32 %v911_v9, %v2273_v28  ;;  %v967_v0 = vmax.f32 %v908_v6, 0.0 }
 0x275   : > { %v968_v12 = vmax.f32 %v910_v8, 0.0 }
 0x276   : > { %v969_v13 = vmax.f32 %v912_v10, 0.0 }
 0x277   : > { %v992_v14 = vpack.c.bf16 %v968_v12, %v966_v11  ;;  %v2310_v12 = vld [vmem:[%s2405_s6] ss:$0 sm:$0xff] }
 0x278   : > { %v993_v15 = vpack.c.bf16 %v969_v13, %v967_v0  ;;  %v915_v16 = vpop.f32.mrb[16].mxu1 }
 0x279   : > { %v916_v20 = vadd.f32 %v915_v16, %v2269_v27  ;;  %v917_v17 = vpop.f32.mrb[17].mxu1 }
 0x27a   : > { %v918_v25 = vadd.f32 %v917_v17, %v2273_v28  ;;  %v919_v23 = vpop.f32.mrb[18].mxu1  ;;  %1193 = vmatprep.mubr.bf16.mxu0 %v993_v15 }
 0x27b   : > { %v920_v26 = vadd.f32 %v919_v23, %v2269_v27  ;;  %v921_v29 = vpop.f32.mrb[19].mxu1  ;;  %1194 = vmatmul.mubr.bf16.gmra.mrb[44].mxu0 %v992_v14  ;;  %v970_v31 = vmax.f32 %v916_v20, 0.0 }
 0x27c   : > { %v922_v30 = vadd.f32 %v921_v29, %v2273_v28  ;;  %v971_v18 = vmax.f32 %v918_v25, 0.0 }
 0x27d   : > { %v972_v32 = vmax.f32 %v920_v26, 0.0 }
 0x27e   : > { %v973_v33 = vmax.f32 %v922_v30, 0.0 }
 0x27f   : > { %v994_v19 = vpack.c.bf16 %v972_v32, %v970_v31 }
 0x280   : > { %v995_v34 = vpack.c.bf16 %v973_v33, %v971_v18  ;;  %v925_v35 = vpop.f32.mrb[20].mxu1 }
 0x281   : > { %v926_v36 = vadd.f32 %v925_v35, %v2269_v27  ;;  %v927_v22 = vpop.f32.mrb[21].mxu1 }
 0x282   : > { %v928_v37 = vadd.f32 %v927_v22, %v2273_v28  ;;  %v929_v38 = vpop.f32.mrb[22].mxu1  ;;  %1201 = vmatprep.mubr.bf16.mxu0 %v995_v34 }
 0x283   : > { %v930_v21 = vadd.f32 %v929_v38, %v2269_v27  ;;  %v931_v24 = vpop.f32.mrb[23].mxu1  ;;  %1202 = vmatmul.mubr.bf16.gmra.mrb[48].mxu0 %v994_v19  ;;  %v974_v40 = vmax.f32 %v926_v36, 0.0 }
 0x284   : > { %v932_v39 = vadd.f32 %v931_v24, %v2273_v28  ;;  %v975_v42 = vmax.f32 %v928_v37, 0.0 }
 0x285   : > { %v976_v41 = vmax.f32 %v930_v21, 0.0 }
 0x286   : > { %v977_v43 = vmax.f32 %v932_v39, 0.0 }
 0x287   : > { %v996_v44 = vpack.c.bf16 %v976_v41, %v974_v40 }
 0x288   : > { %v997_v45 = vpack.c.bf16 %v977_v43, %v975_v42  ;;  %v935_v46 = vpop.f32.mrb[24].mxu1 }
 0x289   : > { %v936_v47 = vadd.f32 %v935_v46, %v2269_v27  ;;  %v937_v48 = vpop.f32.mrb[25].mxu1 }
 0x28a   : > { %v938_v49 = vadd.f32 %v937_v48, %v2273_v28  ;;  %v939_v50 = vpop.f32.mrb[26].mxu1  ;;  %1209 = vmatprep.mubr.bf16.mxu0 %v997_v45 }
 0x28b   : > { %v940_v51 = vadd.f32 %v939_v50, %v2269_v27  ;;  %v941_v52 = vpop.f32.mrb[27].mxu1  ;;  %1210 = vmatmul.mubr.bf16.gmra.mrb[52].mxu0 %v996_v44  ;;  %v978_v54 = vmax.f32 %v936_v47, 0.0 }
 0x28c   : > { %v942_v53 = vadd.f32 %v941_v52, %v2273_v28  ;;  %v979_v56 = vmax.f32 %v938_v49, 0.0 }
 0x28d   : > { %v980_v55 = vmax.f32 %v940_v51, 0.0 }
 0x28e   : > { %v981_v57 = vmax.f32 %v942_v53, 0.0 }
 0x28f   : > { %v998_v58 = vpack.c.bf16 %v980_v55, %v978_v54 }
 0x290   : > { %v999_v59 = vpack.c.bf16 %v981_v57, %v979_v56  ;;  %v945_v60 = vpop.f32.mrb[28].mxu1 }
 0x291   : > { %v946_v61 = vadd.f32 %v945_v60, %v2269_v27  ;;  %v947_v62 = vpop.f32.mrb[29].mxu1 }
 0x292   : > { %v948_v63 = vadd.f32 %v947_v62, %v2273_v28  ;;  %v949_v1 = vpop.f32.mrb[30].mxu1  ;;  %1217 = vmatprep.mubr.bf16.mxu1 %v999_v59 }
 0x293   : > { %v950_v2 = vadd.f32 %v949_v1, %v2269_v27  ;;  %v951_v3 = vpop.f32.mrb[31].mxu1  ;;  %1218 = vmatmul.mubr.bf16.vlgmr.msra.gmra.mrb[32].mxu1 %v998_v58  ;;  %v982_v5 = vmax.f32 %v946_v61, 0.0 }
 0x294   : > { %v952_v4 = vadd.f32 %v951_v3, %v2273_v28  ;;  %v983_v7 = vmax.f32 %v948_v63, 0.0 }
 0x295   : > { %v984_v6 = vmax.f32 %v950_v2, 0.0 }
 0x296   : > { %v985_v8 = vmax.f32 %v952_v4, 0.0 }
 0x297   : > { %v1000_v9 = vpack.c.bf16 %v984_v6, %v982_v5 }
 0x298   : > { %v1001_v10 = vpack.c.bf16 %v985_v8, %v983_v7 }
 0x29a   : > { %1225 = vmatprep.mubr.bf16.mxu1 %v1001_v10 }
 0x29b   : > { %1226 = vmatmul.mubr.bf16.gmra.mrb[36].mxu1 %v1000_v9 }
 0x336   : > { %v1469_v11 = vpop.f32.mrb[32].mxu0 }
 0x337   : > { %v1470_v27 = vpop.f32.mrb[33].mxu0 }
 0x338   : > { %v1471_v0 = vadd.f32 %v1470_v27, %v1469_v11  ;;  %v1472_v13 = vpop.f32.mrb[34].mxu0 }
 0x339   : > { %v1473_v14 = vpop.f32.mrb[35].mxu0 }
 0x33a   : > { %v1172_v28 = vadd.f32 %v1471_v0, %v2310_v12  ;;  %v1474_v15 = vadd.f32 %v1473_v14, %v1472_v13 }
 0x33c   : > { %1234 = vst [vmem:[%s2315_s19] sm:$0xff] %v1172_v28  ;;  %v1175_v16 = vadd.f32 %v1474_v15, %v2310_v12 }
 0x33e   : > { %1235 = vst [vmem:[%s2315_s19 + $0x8] sm:$0xff] %v1175_v16  ;;  %v1475_v20 = vpop.f32.mrb[36].mxu0 }
 0x33f   : > { %v1476_v17 = vpop.f32.mrb[37].mxu0 }
 0x340   : > { %v1477_v25 = vadd.f32 %v1476_v17, %v1475_v20  ;;  %v1478_v23 = vpop.f32.mrb[38].mxu0 }
 0x341   : > { %v1479_v26 = vpop.f32.mrb[39].mxu0 }
 0x342   : > { %v1180_v29 = vadd.f32 %v1477_v25, %v2310_v12  ;;  %v1480_v30 = vadd.f32 %v1479_v26, %v1478_v23 }
 0x344   : > { %1236 = vst [vmem:[%s2315_s19 + $0x10] sm:$0xff] %v1180_v29  ;;  %v1183_v31 = vadd.f32 %v1480_v30, %v2310_v12 }
 0x346   : > { %1237 = vst [vmem:[%s2315_s19 + $0x18] sm:$0xff] %v1183_v31  ;;  %v1481_v32 = vpop.f32.mrb[40].mxu0 }
 0x347   : > { %v1482_v18 = vpop.f32.mrb[41].mxu0 }
 0x348   : > { %v1483_v33 = vadd.f32 %v1482_v18, %v1481_v32  ;;  %v1484_v19 = vpop.f32.mrb[42].mxu0 }
 0x349   : > { %v1485_v34 = vpop.f32.mrb[43].mxu0 }
 0x34a   : > { %v1188_v35 = vadd.f32 %v1483_v33, %v2310_v12  ;;  %v1486_v36 = vadd.f32 %v1485_v34, %v1484_v19 }
 0x34c   : > { %1238 = vst [vmem:[%s2315_s19 + $0x20] sm:$0xff] %v1188_v35  ;;  %v1191_v22 = vadd.f32 %v1486_v36, %v2310_v12 }
 0x34e   : > { %1239 = vst [vmem:[%s2315_s19 + $0x28] sm:$0xff] %v1191_v22  ;;  %v1487_v37 = vpop.f32.mrb[44].mxu0 }
 0x34f   : > { %v1488_v38 = vpop.f32.mrb[45].mxu0 }
 0x350   : > { %v1489_v21 = vadd.f32 %v1488_v38, %v1487_v37  ;;  %v1490_v24 = vpop.f32.mrb[46].mxu0 }
 0x351   : > { %v1491_v39 = vpop.f32.mrb[47].mxu0 }
 0x352   : > { %v1196_v40 = vadd.f32 %v1489_v21, %v2310_v12  ;;  %v1492_v41 = vadd.f32 %v1491_v39, %v1490_v24 }
 0x354   : > { %1240 = vst [vmem:[%s2315_s19 + $0x30] sm:$0xff] %v1196_v40  ;;  %v1199_v42 = vadd.f32 %v1492_v41, %v2310_v12 }
 0x356   : > { %1241 = vst [vmem:[%s2315_s19 + $0x38] sm:$0xff] %v1199_v42  ;;  %v1493_v43 = vpop.f32.mrb[48].mxu0 }
 0x357   : > { %v1494_v44 = vpop.f32.mrb[49].mxu0 }
 0x358   : > { %v1495_v45 = vadd.f32 %v1494_v44, %v1493_v43  ;;  %v1496_v46 = vpop.f32.mrb[50].mxu0 }
 0x359   : > { %v1497_v47 = vpop.f32.mrb[51].mxu0 }
 0x35a   : > { %v1204_v48 = vadd.f32 %v1495_v45, %v2310_v12  ;;  %v1498_v49 = vadd.f32 %v1497_v47, %v1496_v46 }
 0x35c   : > { %1242 = vst [vmem:[%s2315_s19 + $0x40] sm:$0xff] %v1204_v48  ;;  %v1207_v50 = vadd.f32 %v1498_v49, %v2310_v12 }
 0x35e   : > { %1243 = vst [vmem:[%s2315_s19 + $0x48] sm:$0xff] %v1207_v50  ;;  %v1499_v51 = vpop.f32.mrb[52].mxu0 }
 0x35f   : > { %v1500_v52 = vpop.f32.mrb[53].mxu0 }
 0x360   : > { %v1501_v53 = vadd.f32 %v1500_v52, %v1499_v51  ;;  %v1502_v54 = vpop.f32.mrb[54].mxu0 }
 0x361   : > { %v1503_v55 = vpop.f32.mrb[55].mxu0 }
 0x362   : > { %v1212_v56 = vadd.f32 %v1501_v53, %v2310_v12  ;;  %v1504_v57 = vadd.f32 %v1503_v55, %v1502_v54 }
 0x364   : > { %1244 = vst [vmem:[%s2315_s19 + $0x50] sm:$0xff] %v1212_v56  ;;  %v1215_v58 = vadd.f32 %v1504_v57, %v2310_v12 }
 0x366   : > { %1245 = vst [vmem:[%s2315_s19 + $0x58] sm:$0xff] %v1215_v58  ;;  %v1505_v59 = vpop.f32.mrb[32].mxu1 }
 0x367   : > { %v1506_v60 = vpop.f32.mrb[33].mxu1 }
 0x368   : > { %v1507_v61 = vadd.f32 %v1506_v60, %v1505_v59  ;;  %v1508_v62 = vpop.f32.mrb[34].mxu1 }
 0x369   : > { %v1509_v63 = vpop.f32.mrb[35].mxu1 }
 0x36a   : > { %v1220_v1 = vadd.f32 %v1507_v61, %v2310_v12  ;;  %v1510_v2 = vadd.f32 %v1509_v63, %v1508_v62 }
 0x36c   : > { %1246 = vst [vmem:[%s2315_s19 + $0x60] sm:$0xff] %v1220_v1  ;;  %v1223_v3 = vadd.f32 %v1510_v2, %v2310_v12 }
 0x36e   : > { %1247 = vst [vmem:[%s2315_s19 + $0x68] sm:$0xff] %v1223_v3  ;;  %v1511_v4 = vpop.f32.mrb[36].mxu1 }
 0x36f   : > { %v1512_v5 = vpop.f32.mrb[37].mxu1 }
 0x370   : > { %v1513_v6 = vadd.f32 %v1512_v5, %v1511_v4  ;;  %v1514_v7 = vpop.f32.mrb[38].mxu1 }
 0x371   : > { %v1515_v8 = vpop.f32.mrb[39].mxu1 }
 0x372   : > { %v1228_v9 = vadd.f32 %v1513_v6, %v2310_v12  ;;  %v1516_v10 = vadd.f32 %v1515_v8, %v1514_v7 }
 0x374   : > { %1248 = vst [vmem:[%s2315_s19 + $0x70] sm:$0xff] %v1228_v9  ;;  %v1231_v11 = vadd.f32 %v1516_v10, %v2310_v12 }
 0x376   : > { %1249 = vst [vmem:[%s2315_s19 + $0x78] sm:$0xff] %v1231_v11 }
 0x377   : > { %1832 = shalt.err (!%p1829_p4)
}
 0x378   : > { %s1833_s13 = scalar_lea.hbm %s2350_s10, 2048  ;;  %s1837_s8 = scalar_lea.hbm %s2406_s7, 4096 }
 0x379   : > { %p1834_p9 = scmp.ne.s32.totalorder %s2350_s10, %s1833_s13  ;;  %p1838_p8 = scmp.lt.u32.totalorder %s2350_s10, %s2406_s7 }
 0x37a   : > { %p1839_p13 = scmp.lt.u32.totalorder %s1837_s8, %s1833_s13  ;;  %p1841_p10 = scmp.lt.u32.totalorder %s1833_s13, %s2350_s10 }
 0x37b   : > { %p1835_p0 = pnand %p1834_p9, %p2098_p5 }
 0x37c   : > { %p1840_p6 = por %p1839_p13, %p1838_p8 }
 0x37d   : > { %p1836_p11 = pneg %p1835_p0 }
 0x37e   : > { %p1842_p3 = por %p1841_p10, %p1840_p6 }
 0x380   : > { %p1843_p7 = pnand %p1842_p3, %p1836_p11 }
 0x382   : > { %1846 = shalt.err (!%p1843_p7)
}
 0x383   : > { %s1905_s16 = smov 128   ;;  %s1906_s11 = smov 8  }
 0x384   : > { %1547 = dma.vmem_to_hbm [thread:$0]  (%p2098_p5), %s2352_s29, 2048, %s2350_s10, %s1251_s28, %s1905_s16, %s1905_s16, %s1906_s11  }
 0x385 PF: > { %s2426_s22 = sld [smem:[#allocation15_spill]]  ;;  %s1279_s17 = sand.u32 1, %s1881_s24  }
 0x386   : > { %p2428_p1 = scmp.ge.s32.totalorder %s1893_s27, 2  ;;  %s1280_s30 = scalar_lea.sflag [#allocation4], %s1279_s17 }
 0x38b   : > { %p2427_p12 = scmp.ne.s32.totalorder %s2426_s22, 0 }
 0x38d   : > { %p1564_p2 = pnand %p2428_p1, %p2427_p12 }
 0x38f   : > { %1876 = dma.done.wait (!%p1564_p2), %s1280_s30, 2048  }
 0x390   : > { %1878 = vsyncadd (!%p1564_p2), %s1280_s30, 4294965248  ;;  %p22_p4 = scmp.ge.s32.totalorder %s2084_s18, 4   ;;  %s2429_s24 = smov %s1885_s25 }
 0x391   : > { %s2430_s25 = smov %s1889_s26  ;;  %s2431_s26 = smov %s2094_s21 }
 0x392   : > { %s2432_s27 = smov %s2084_s18  ;;  %24 = sbr.rel (!%p22_p4) target bundleno = 7 (0x7), region = 105 }
 0x399   :  { %1285 = vsyncpa [#allocation3], 1 }
 0x39a   :  { %1287 = vsyncpa [#allocation3 + $0x1], 1 }
 0x39b   :  { %1288 = vsyncpa [#allocation6], 1 }
 0x39c   :  { %1289 = vsyncpa [#allocation9], 1 }
 0x39d   :  { %1290 = vsyncpa [#allocation4], 1 }
 0x39e   :  { %1292 = vsyncpa [#allocation4 + $0x1], 1 }

</bundles_post_ra>
